<compile_context>
chip_gen: v5e
topology: v5e:2x2
jax: 0.10.0
libtpu: 0.0.40
codegen_flags: <defaults>
</compile_context>

<pallas_src>
import functools

import jax
import jax.numpy as jnp
from jax.experimental import pallas as pl
from jax.experimental.pallas import tpu as pltpu


# ---------------------------------------------------------------------------
# LSTM cell elementwise math (f32).  Gate ordering follows PyTorch: i, f, g, o.
# ---------------------------------------------------------------------------
def _lstm_cell_step(gates, c_prev, H):
    i = jax.nn.sigmoid(gates[:, 0 * H:1 * H])
    f = jax.nn.sigmoid(gates[:, 1 * H:2 * H])
    g = jnp.tanh(gates[:, 2 * H:3 * H])
    o = jax.nn.sigmoid(gates[:, 3 * H:4 * H])
    c_new = f * c_prev + i * g
    h_new = o * jnp.tanh(c_new)
    return h_new, c_new


# ---------------------------------------------------------------------------
# Fused kernel: LSTM layer 0 -> LSTM layer 1 (software-pipelined) ->
# (eval dropout) -> flatten -> linear head.
# ---------------------------------------------------------------------------
def _fused_lstm_linear_kernel(x_ref, wih0t_ref, whh0t_ref, b0_ref,
                              wih1t_ref, whh1t_ref, b1_ref,
                              wlint_ref, blin_ref, h0_ref, c0_ref,
                              pre_ref, hn_ref, cn_ref,
                              gx0_sc, hid_sc, *, T, B, E, H):
    f32 = jnp.float32
    bf16 = jnp.bfloat16

    # ---- Layer 0: input projection for ALL timesteps in one bf16 MXU matmul.
    # x is already time-major, so the result lands in (T, B, 4H) leading-axis
    # order -> gx0_sc[t] inside the serial loop is a contiguous read.
    x_flat = x_ref[...].reshape(T * B, E)                       # rows = t*B + b
    gx0 = jnp.dot(x_flat, wih0t_ref[...],
                  preferred_element_type=f32) + b0_ref[...]     # (T*B, 4H) f32
    gx0_sc[...] = gx0.reshape(T, B, 4 * H)

    whh0t = whh0t_ref[...]                                      # (H, 4H) bf16
    wih1t = wih1t_ref[...]                                      # (H, 4H) bf16
    whh1t = whh1t_ref[...]                                      # (H, 4H) bf16
    b1 = b1_ref[...]                                            # (1, 4H) f32

    h0l, c0l = h0_ref[0], c0_ref[0]                             # layer-0 state (f32)
    h1l, c1l = h0_ref[1], c0_ref[1]                             # layer-1 state (f32)

    # ---- Software-pipelined recurrence: iteration t runs layer-0 step t and
    # layer-1 step t-1; the two serial matmul chains overlap.
    # TODO(synk): for large T replace the unrolled Python loop with
    # lax.fori_loop(..., unroll=2..4) + pl.ds indexing to bound live ranges.
    y0_prev = None
    for t in range(T + 1):
        if t > 0:                                               # layer-1, step t-1
            g1 = (jnp.dot(y0_prev, wih1t, preferred_element_type=f32) + b1
                  + jnp.dot(h1l.astype(bf16), whh1t,
                            preferred_element_type=f32))
            h1l, c1l = _lstm_cell_step(g1, c1l, H)
            hid_sc[t - 1] = h1l                                 # contiguous leading-axis store
        if t < T:                                               # layer-0, step t
            g0 = gx0_sc[t] + jnp.dot(h0l.astype(bf16), whh0t,
                                     preferred_element_type=f32)
            h0l, c0l = _lstm_cell_step(g0, c0l, H)
            y0_prev = h0l.astype(bf16)

    hn_ref[0] = h0l
    cn_ref[0] = c0l
    hn_ref[1] = h1l
    cn_ref[1] = c1l

    # ---- Dropout(0.3) == identity in eval mode; flatten + Linear head.
    # Computed in t*B+b row order (no in-loop strided stores; lane-dense padded
    # output slab); the wrapper permutes rows back to Flatten(0,1) order.
    # TODO(synk): train-mode dropout mask via pltpu.prng_* if training is needed.
    # TODO(synk): for real vocab sizes tile this head over (rows, W) with a grid
    # so the (H, W) weights / (T*B, W) output stream through VMEM.
    hid_flat = hid_sc[...].reshape(T * B, H).astype(bf16)
    pre_ref[...] = (jnp.dot(hid_flat, wlint_ref[...],
                            preferred_element_type=f32) + blin_ref[...])


# ---------------------------------------------------------------------------
# Wrapper: one-time layout prep (time-major input, pre-transposed bf16 weights,
# lane-dense padded head) and a single fused pallas_call.
# Returns (pre, (h_n, c_n)) exactly like the PyTorch module.
# ---------------------------------------------------------------------------
def my_model_forward(xs_embedding, params, h_0=None, c_0=None):
    B, T, E = xs_embedding.shape
    H = params["hidden"]
    W = params["lin_w"].shape[0]
    Wp = (W + 127) // 128 * 128          # lane-dense padded head width
    if h_0 is None or c_0 is None:
        h_0 = jnp.zeros((2, B, H), jnp.float32)
        c_0 = jnp.zeros((2, B, H), jnp.float32)

    (w_ih0, w_hh0, b0), (w_ih1, w_hh1, b1) = params["lstm"]
    bf16 = jnp.bfloat16

    # One-time XLA-side prep (off the kernel's serial path).
    x_tm = jnp.transpose(xs_embedding, (1, 0, 2)).astype(bf16)     # (T, B, E)
    wih0t = w_ih0.T.astype(bf16)                                   # (E, 4H)
    whh0t = w_hh0.T.astype(bf16)                                   # (H, 4H)
    wih1t = w_ih1.T.astype(bf16)                                   # (H, 4H)
    whh1t = w_hh1.T.astype(bf16)                                   # (H, 4H)
    wlint = jnp.pad(params["lin_w"].T, ((0, 0), (0, Wp - W))).astype(bf16)
    blin = jnp.pad(params["lin_b"], (0, Wp - W)).reshape(1, Wp)
    b0r = b0.reshape(1, 4 * H)
    b1r = b1.reshape(1, 4 * H)

    operands = (x_tm, wih0t, whh0t, b0r, wih1t, whh1t, b1r, wlint, blin,
                h_0, c_0)

    # Scoped-VMEM budget from the actual footprint (defaults are 16/32 MiB);
    # capped below v7x's 64 MiB physical VMEM.
    in_bytes = sum(int(a.size) * a.dtype.itemsize for a in operands)
    out_bytes = (T * B * Wp + 2 * 2 * B * H) * 4
    scratch_bytes = (T * B * 4 * H + T * B * H) * 4
    vmem_limit = int(min(max(2 * (in_bytes + out_bytes + scratch_bytes),
                             32 * 1024 * 1024), 60 * 1024 * 1024))

    kernel = functools.partial(_fused_lstm_linear_kernel, T=T, B=B, E=E, H=H)
    vmem = pl.BlockSpec(memory_space=pltpu.MemorySpace.VMEM)
    # TODO(synk): for B >= 8 add a batch grid (blocked over sublanes) with
    # dimension_semantics=("parallel",) so both v7x TensorCores are used and
    # input DMA is double-buffered.
    pre_tm, hn, cn = pl.pallas_call(
        kernel,
        out_shape=(jax.ShapeDtypeStruct((T * B, Wp), jnp.float32),
                   jax.ShapeDtypeStruct((2, B, H), jnp.float32),
                   jax.ShapeDtypeStruct((2, B, H), jnp.float32)),
        in_specs=[vmem] * len(operands),
        out_specs=(vmem, vmem, vmem),
        scratch_shapes=[pltpu.VMEM((T, B, 4 * H), jnp.float32),  # layer-0 gate preacts
                        pltpu.VMEM((T, B, H), jnp.float32)],     # layer-1 hidden seq
        compiler_params=pltpu.CompilerParams(vmem_limit_bytes=vmem_limit),
    )(*operands)

    # Kernel rows are in t*B+b order; permute back to Flatten(0,1) (b*T+t)
    # order and drop the lane padding.  Single cheap XLA permute.
    pre = jnp.transpose(pre_tm.reshape(T, B, Wp)[:, :, :W],
                        (1, 0, 2)).reshape(B * T, W)
    return pre, (hn, cn)


# ---------------------------------------------------------------------------
# Pure-JAX f32 reference (PyTorch semantics), for the correctness check.
# ---------------------------------------------------------------------------
def _ref_forward(xs, params, h_0, c_0):
    B, T, _ = xs.shape
    H = params["hidden"]
    layer_in = xs
    hns, cns = [], []
    for layer in range(2):
        w_ih, w_hh, b = params["lstm"][layer]
        h, c = h_0[layer], c_0[layer]
        outs = []
        for t in range(T):
            gates = layer_in[:, t, :] @ w_ih.T + h @ w_hh.T + b
            i = jax.nn.sigmoid(gates[:, :H])
            f = jax.nn.sigmoid(gates[:, H:2 * H])
            g = jnp.tanh(gates[:, 2 * H:3 * H])
            o = jax.nn.sigmoid(gates[:, 3 * H:])
            c = f * c + i * g
            h = o * jnp.tanh(c)
            outs.append(h)
        layer_in = jnp.stack(outs, axis=1)            # (B, T, H)
        hns.append(h)
        cns.append(c)
    pre = layer_in.reshape(B * T, H) @ params["lin_w"].T + params["lin_b"]
    return pre, jnp.stack(hns), jnp.stack(cns)


def init_params(key, embedding_num, hidden_num, word_size):
    """Deterministic init mimicking PyTorch uniform(-1/sqrt(H), 1/sqrt(H))."""
    scale = 1.0 / jnp.sqrt(hidden_num)
    keys = jax.random.split(key, 11)
    params = {"hidden": hidden_num, "lstm": []}
    kidx = 0
    for layer in range(2):
        in_sz = embedding_num if layer == 0 else hidden_num
        w_ih = jax.random.uniform(keys[kidx], (4 * hidden_num, in_sz),
                                  jnp.float32, -scale, scale); kidx += 1
        w_hh = jax.random.uniform(keys[kidx], (4 * hidden_num, hidden_num),
                                  jnp.float32, -scale, scale); kidx += 1
        b_ih = jax.random.uniform(keys[kidx], (4 * hidden_num,),
                                  jnp.float32, -scale, scale); kidx += 1
        b_hh = jax.random.uniform(keys[kidx], (4 * hidden_num,),
                                  jnp.float32, -scale, scale); kidx += 1
        params["lstm"].append((w_ih, w_hh, b_ih + b_hh))
    params["lin_w"] = jax.random.uniform(keys[kidx], (word_size, hidden_num),
                                         jnp.float32, -scale, scale); kidx += 1
    params["lin_b"] = jax.random.uniform(keys[kidx], (word_size,),
                                         jnp.float32, -scale, scale)
    return params


if __name__ == "__main__":
    embeddingNum, hiddenNum, wordSize = 32, 32, 64
    B, T = 2, 8

    key = jax.random.PRNGKey(0)
    k_params, k_x = jax.random.split(key)
    params = init_params(k_params, embeddingNum, hiddenNum, wordSize)
    xs = jax.random.normal(k_x, (B, T, embeddingNum), jnp.float32)

    pre, (h_n, c_n) = my_model_forward(xs, params)
    jax.block_until_ready((pre, h_n, c_n))

    assert pre.shape == (B * T, wordSize)
    assert h_n.shape == (2, B, hiddenNum)
    assert c_n.shape == (2, B, hiddenNum)

    # Numerical sanity check against the pure-f32 JAX reference.  The kernel
    # uses bf16 weights/activations with f32 accumulation, so tolerance is
    # looser than a pure-f32 implementation would need.
    h0 = jnp.zeros((2, B, hiddenNum), jnp.float32)
    c0 = jnp.zeros((2, B, hiddenNum), jnp.float32)
    pre_r, hn_r, cn_r = _ref_forward(xs, params, h0, c0)
    assert jnp.allclose(pre, pre_r, atol=5e-2, rtol=5e-2)
    assert jnp.allclose(h_n, hn_r, atol=3e-2, rtol=3e-2)
    assert jnp.allclose(c_n, cn_r, atol=3e-2, rtol=3e-2)

    print("KERNEL_OK")
</pallas_src>

<mosaic_0001>
module attributes {stable_mosaic.version = 11 : i64} {
  func.func @_fused_lstm_linear_kernel(%arg0: memref<8x2x32xbf16, #tpu.memory_space<vmem>>, %arg1: memref<32x128xbf16, #tpu.memory_space<vmem>>, %arg2: memref<32x128xbf16, #tpu.memory_space<vmem>>, %arg3: memref<1x128xf32, #tpu.memory_space<vmem>>, %arg4: memref<32x128xbf16, #tpu.memory_space<vmem>>, %arg5: memref<32x128xbf16, #tpu.memory_space<vmem>>, %arg6: memref<1x128xf32, #tpu.memory_space<vmem>>, %arg7: memref<32x128xbf16, #tpu.memory_space<vmem>>, %arg8: memref<1x128xf32, #tpu.memory_space<vmem>>, %arg9: memref<2x2x32xf32, #tpu.memory_space<vmem>>, %arg10: memref<2x2x32xf32, #tpu.memory_space<vmem>>, %arg11: memref<16x128xf32, #tpu.memory_space<vmem>>, %arg12: memref<2x2x32xf32, #tpu.memory_space<vmem>>, %arg13: memref<2x2x32xf32, #tpu.memory_space<vmem>>, %arg14: memref<8x2x128xf32, #tpu.memory_space<vmem>>, %arg15: memref<8x2x32xf32, #tpu.memory_space<vmem>>) attributes {dimension_semantics = [], scalar_prefetch = 0 : i64, scratch_operands = 2 : i64, tpu.core_type = #tpu.core_type<tc>} {
    %c0 = arith.constant 0 : index
    %c0_0 = arith.constant 0 : index
    %c0_1 = arith.constant 0 : index
    %0 = vector.load %arg0[%c0, %c0_0, %c0_1] : memref<8x2x32xbf16, #tpu.memory_space<vmem>>, vector<8x2x32xbf16>
    %1 = vector.shape_cast %0 : vector<8x2x32xbf16> to vector<16x32xbf16>
    %c0_2 = arith.constant 0 : index
    %c0_3 = arith.constant 0 : index
    %2 = vector.load %arg1[%c0_2, %c0_3] : memref<32x128xbf16, #tpu.memory_space<vmem>>, vector<32x128xbf16>
    %cst = arith.constant dense<0.000000e+00> : vector<16x128xf32>
    %3 = tpu.matmul %1, %2, %cst {dimension_numbers = #tpu.dot_dimension_numbers<[1], [0], [0], [1], [0, 0, 1, 1], [], []>} : vector<16x32xbf16>, vector<32x128xbf16>, vector<16x128xf32> -> vector<16x128xf32>
    %c0_4 = arith.constant 0 : index
    %c0_5 = arith.constant 0 : index
    %4 = vector.load %arg3[%c0_4, %c0_5] : memref<1x128xf32, #tpu.memory_space<vmem>>, vector<1x128xf32>
    %5 = vector.broadcast %4 : vector<1x128xf32> to vector<16x128xf32>
    %6 = arith.addf %3, %5 : vector<16x128xf32>
    %7 = vector.shape_cast %6 : vector<16x128xf32> to vector<8x2x128xf32>
    %c0_6 = arith.constant 0 : index
    %c0_7 = arith.constant 0 : index
    %c0_8 = arith.constant 0 : index
    %8 = vector.load %arg14[%c0_6, %c0_7, %c0_8] : memref<8x2x128xf32, #tpu.memory_space<vmem>>, vector<8x2x128xf32>
    tpu.vector_store %arg14[%c0_6, %c0_7, %c0_8], %7 {strides = array<i32>} : memref<8x2x128xf32, #tpu.memory_space<vmem>>, vector<8x2x128xf32>,
    %c0_9 = arith.constant 0 : index
    %c0_10 = arith.constant 0 : index
    %9 = vector.load %arg2[%c0_9, %c0_10] : memref<32x128xbf16, #tpu.memory_space<vmem>>, vector<32x128xbf16>
    %c0_11 = arith.constant 0 : index
    %c0_12 = arith.constant 0 : index
    %10 = vector.load %arg4[%c0_11, %c0_12] : memref<32x128xbf16, #tpu.memory_space<vmem>>, vector<32x128xbf16>
    %c0_13 = arith.constant 0 : index
    %c0_14 = arith.constant 0 : index
    %11 = vector.load %arg5[%c0_13, %c0_14] : memref<32x128xbf16, #tpu.memory_space<vmem>>, vector<32x128xbf16>
    %c0_15 = arith.constant 0 : index
    %c0_16 = arith.constant 0 : index
    %12 = vector.load %arg6[%c0_15, %c0_16] : memref<1x128xf32, #tpu.memory_space<vmem>>, vector<1x128xf32>
    %c0_17 = arith.constant 0 : index
    %c0_18 = arith.constant 0 : index
    %c0_19 = arith.constant 0 : index
    %13 = vector.load %arg9[%c0_17, %c0_18, %c0_19] : memref<2x2x32xf32, #tpu.memory_space<vmem>>, vector<1x2x32xf32>
    %14 = vector.shape_cast %13 : vector<1x2x32xf32> to vector<2x32xf32>
    %c0_20 = arith.constant 0 : index
    %c0_21 = arith.constant 0 : index
    %c0_22 = arith.constant 0 : index
    %15 = vector.load %arg10[%c0_20, %c0_21, %c0_22] : memref<2x2x32xf32, #tpu.memory_space<vmem>>, vector<1x2x32xf32>
    %16 = vector.shape_cast %15 : vector<1x2x32xf32> to vector<2x32xf32>
    %c1 = arith.constant 1 : index
    %c0_23 = arith.constant 0 : index
    %c0_24 = arith.constant 0 : index
    %17 = vector.load %arg9[%c1, %c0_23, %c0_24] : memref<2x2x32xf32, #tpu.memory_space<vmem>>, vector<1x2x32xf32>
    %18 = vector.shape_cast %17 : vector<1x2x32xf32> to vector<2x32xf32>
    %c1_25 = arith.constant 1 : index
    %c0_26 = arith.constant 0 : index
    %c0_27 = arith.constant 0 : index
    %19 = vector.load %arg10[%c1_25, %c0_26, %c0_27] : memref<2x2x32xf32, #tpu.memory_space<vmem>>, vector<1x2x32xf32>
    %20 = vector.shape_cast %19 : vector<1x2x32xf32> to vector<2x32xf32>
    %c0_28 = arith.constant 0 : index
    %c0_29 = arith.constant 0 : index
    %c0_30 = arith.constant 0 : index
    %21 = vector.load %arg14[%c0_28, %c0_29, %c0_30] : memref<8x2x128xf32, #tpu.memory_space<vmem>>, vector<1x2x128xf32>
    %22 = vector.shape_cast %21 : vector<1x2x128xf32> to vector<2x128xf32>
    %23 = arith.truncf %14 : vector<2x32xf32> to vector<2x32xbf16>
    %cst_31 = arith.constant dense<0.000000e+00> : vector<2x128xf32>
    %24 = tpu.matmul %23, %9, %cst_31 {dimension_numbers = #tpu.dot_dimension_numbers<[1], [0], [0], [1], [0, 0, 1, 1], [], []>} : vector<2x32xbf16>, vector<32x128xbf16>, vector<2x128xf32> -> vector<2x128xf32>
    %25 = arith.addf %22, %24 : vector<2x128xf32>
    %26 = vector.extract_strided_slice %25 {offsets = [0, 0], sizes = [2, 32], strides = [1, 1]} : vector<2x128xf32> to vector<2x32xf32>
    %27 = arith.negf %26 : vector<2x32xf32>
    %28 = math.exp %27 : vector<2x32xf32>
    %cst_32 = arith.constant 1.000000e+00 : f32
    %29 = vector.broadcast %cst_32 : f32 to vector<2x32xf32>
    %30 = arith.addf %29, %28 : vector<2x32xf32>
    %31 = arith.divf %29, %30 : vector<2x32xf32>
    %32 = vector.extract_strided_slice %25 {offsets = [0, 32], sizes = [2, 32], strides = [1, 1]} : vector<2x128xf32> to vector<2x32xf32>
    %33 = arith.negf %32 : vector<2x32xf32>
    %34 = math.exp %33 : vector<2x32xf32>
    %cst_33 = arith.constant 1.000000e+00 : f32
    %35 = vector.broadcast %cst_33 : f32 to vector<2x32xf32>
    %36 = arith.addf %35, %34 : vector<2x32xf32>
    %37 = arith.divf %35, %36 : vector<2x32xf32>
    %38 = vector.extract_strided_slice %25 {offsets = [0, 64], sizes = [2, 32], strides = [1, 1]} : vector<2x128xf32> to vector<2x32xf32>
    %39 = math.tanh %38 : vector<2x32xf32>
    %40 = vector.extract_strided_slice %25 {offsets = [0, 96], sizes = [2, 32], strides = [1, 1]} : vector<2x128xf32> to vector<2x32xf32>
    %41 = arith.negf %40 : vector<2x32xf32>
    %42 = math.exp %41 : vector<2x32xf32>
    %cst_34 = arith.constant 1.000000e+00 : f32
    %43 = vector.broadcast %cst_34 : f32 to vector<2x32xf32>
    %44 = arith.addf %43, %42 : vector<2x32xf32>
    %45 = arith.divf %43, %44 : vector<2x32xf32>
    %46 = arith.mulf %37, %16 : vector<2x32xf32>
    %47 = arith.mulf %31, %39 : vector<2x32xf32>
    %48 = arith.addf %46, %47 : vector<2x32xf32>
    %49 = math.tanh %48 : vector<2x32xf32>
    %50 = arith.mulf %45, %49 : vector<2x32xf32>
    %51 = arith.truncf %50 : vector<2x32xf32> to vector<2x32xbf16>
    %cst_35 = arith.constant dense<0.000000e+00> : vector<2x128xf32>
    %52 = tpu.matmul %51, %10, %cst_35 {dimension_numbers = #tpu.dot_dimension_numbers<[1], [0], [0], [1], [0, 0, 1, 1], [], []>} : vector<2x32xbf16>, vector<32x128xbf16>, vector<2x128xf32> -> vector<2x128xf32>
    %53 = vector.broadcast %12 : vector<1x128xf32> to vector<2x128xf32>
    %54 = arith.addf %52, %53 : vector<2x128xf32>
    %55 = arith.truncf %18 : vector<2x32xf32> to vector<2x32xbf16>
    %cst_36 = arith.constant dense<0.000000e+00> : vector<2x128xf32>
    %56 = tpu.matmul %55, %11, %cst_36 {dimension_numbers = #tpu.dot_dimension_numbers<[1], [0], [0], [1], [0, 0, 1, 1], [], []>} : vector<2x32xbf16>, vector<32x128xbf16>, vector<2x128xf32> -> vector<2x128xf32>
    %57 = arith.addf %54, %56 : vector<2x128xf32>
    %58 = vector.extract_strided_slice %57 {offsets = [0, 0], sizes = [2, 32], strides = [1, 1]} : vector<2x128xf32> to vector<2x32xf32>
    %59 = arith.negf %58 : vector<2x32xf32>
    %60 = math.exp %59 : vector<2x32xf32>
    %cst_37 = arith.constant 1.000000e+00 : f32
    %61 = vector.broadcast %cst_37 : f32 to vector<2x32xf32>
    %62 = arith.addf %61, %60 : vector<2x32xf32>
    %63 = arith.divf %61, %62 : vector<2x32xf32>
    %64 = vector.extract_strided_slice %57 {offsets = [0, 32], sizes = [2, 32], strides = [1, 1]} : vector<2x128xf32> to vector<2x32xf32>
    %65 = arith.negf %64 : vector<2x32xf32>
    %66 = math.exp %65 : vector<2x32xf32>
    %cst_38 = arith.constant 1.000000e+00 : f32
    %67 = vector.broadcast %cst_38 : f32 to vector<2x32xf32>
    %68 = arith.addf %67, %66 : vector<2x32xf32>
    %69 = arith.divf %67, %68 : vector<2x32xf32>
    %70 = vector.extract_strided_slice %57 {offsets = [0, 64], sizes = [2, 32], strides = [1, 1]} : vector<2x128xf32> to vector<2x32xf32>
    %71 = math.tanh %70 : vector<2x32xf32>
    %72 = vector.extract_strided_slice %57 {offsets = [0, 96], sizes = [2, 32], strides = [1, 1]} : vector<2x128xf32> to vector<2x32xf32>
    %73 = arith.negf %72 : vector<2x32xf32>
    %74 = math.exp %73 : vector<2x32xf32>
    %cst_39 = arith.constant 1.000000e+00 : f32
    %75 = vector.broadcast %cst_39 : f32 to vector<2x32xf32>
    %76 = arith.addf %75, %74 : vector<2x32xf32>
    %77 = arith.divf %75, %76 : vector<2x32xf32>
    %78 = arith.mulf %69, %20 : vector<2x32xf32>
    %79 = arith.mulf %63, %71 : vector<2x32xf32>
    %80 = arith.addf %78, %79 : vector<2x32xf32>
    %81 = math.tanh %80 : vector<2x32xf32>
    %82 = arith.mulf %77, %81 : vector<2x32xf32>
    %c0_40 = arith.constant 0 : index
    %c0_41 = arith.constant 0 : index
    %c0_42 = arith.constant 0 : index
    %83 = vector.load %arg15[%c0_40, %c0_41, %c0_42] : memref<8x2x32xf32, #tpu.memory_space<vmem>>, vector<1x2x32xf32>
    %84 = vector.shape_cast %83 : vector<1x2x32xf32> to vector<2x32xf32>
    %85 = vector.shape_cast %82 : vector<2x32xf32> to vector<1x2x32xf32>
    tpu.vector_store %arg15[%c0_40, %c0_41, %c0_42], %85 {strides = array<i32>} : memref<8x2x32xf32, #tpu.memory_space<vmem>>, vector<1x2x32xf32>,
    %c1_43 = arith.constant 1 : index
    %c0_44 = arith.constant 0 : index
    %c0_45 = arith.constant 0 : index
    %86 = vector.load %arg14[%c1_43, %c0_44, %c0_45] : memref<8x2x128xf32, #tpu.memory_space<vmem>>, vector<1x2x128xf32>
    %87 = vector.shape_cast %86 : vector<1x2x128xf32> to vector<2x128xf32>
    %88 = arith.truncf %50 : vector<2x32xf32> to vector<2x32xbf16>
    %cst_46 = arith.constant dense<0.000000e+00> : vector<2x128xf32>
    %89 = tpu.matmul %88, %9, %cst_46 {dimension_numbers = #tpu.dot_dimension_numbers<[1], [0], [0], [1], [0, 0, 1, 1], [], []>} : vector<2x32xbf16>, vector<32x128xbf16>, vector<2x128xf32> -> vector<2x128xf32>
    %90 = arith.addf %87, %89 : vector<2x128xf32>
    %91 = vector.extract_strided_slice %90 {offsets = [0, 0], sizes = [2, 32], strides = [1, 1]} : vector<2x128xf32> to vector<2x32xf32>
    %92 = arith.negf %91 : vector<2x32xf32>
    %93 = math.exp %92 : vector<2x32xf32>
    %cst_47 = arith.constant 1.000000e+00 : f32
    %94 = vector.broadcast %cst_47 : f32 to vector<2x32xf32>
    %95 = arith.addf %94, %93 : vector<2x32xf32>
    %96 = arith.divf %94, %95 : vector<2x32xf32>
    %97 = vector.extract_strided_slice %90 {offsets = [0, 32], sizes = [2, 32], strides = [1, 1]} : vector<2x128xf32> to vector<2x32xf32>
    %98 = arith.negf %97 : vector<2x32xf32>
    %99 = math.exp %98 : vector<2x32xf32>
    %cst_48 = arith.constant 1.000000e+00 : f32
    %100 = vector.broadcast %cst_48 : f32 to vector<2x32xf32>
    %101 = arith.addf %100, %99 : vector<2x32xf32>
    %102 = arith.divf %100, %101 : vector<2x32xf32>
    %103 = vector.extract_strided_slice %90 {offsets = [0, 64], sizes = [2, 32], strides = [1, 1]} : vector<2x128xf32> to vector<2x32xf32>
    %104 = math.tanh %103 : vector<2x32xf32>
    %105 = vector.extract_strided_slice %90 {offsets = [0, 96], sizes = [2, 32], strides = [1, 1]} : vector<2x128xf32> to vector<2x32xf32>
    %106 = arith.negf %105 : vector<2x32xf32>
    %107 = math.exp %106 : vector<2x32xf32>
    %cst_49 = arith.constant 1.000000e+00 : f32
    %108 = vector.broadcast %cst_49 : f32 to vector<2x32xf32>
    %109 = arith.addf %108, %107 : vector<2x32xf32>
    %110 = arith.divf %108, %109 : vector<2x32xf32>
    %111 = arith.mulf %102, %48 : vector<2x32xf32>
    %112 = arith.mulf %96, %104 : vector<2x32xf32>
    %113 = arith.addf %111, %112 : vector<2x32xf32>
    %114 = math.tanh %113 : vector<2x32xf32>
    %115 = arith.mulf %110, %114 : vector<2x32xf32>
    %116 = arith.truncf %115 : vector<2x32xf32> to vector<2x32xbf16>
    %cst_50 = arith.constant dense<0.000000e+00> : vector<2x128xf32>
    %117 = tpu.matmul %116, %10, %cst_50 {dimension_numbers = #tpu.dot_dimension_numbers<[1], [0], [0], [1], [0, 0, 1, 1], [], []>} : vector<2x32xbf16>, vector<32x128xbf16>, vector<2x128xf32> -> vector<2x128xf32>
    %118 = vector.broadcast %12 : vector<1x128xf32> to vector<2x128xf32>
    %119 = arith.addf %117, %118 : vector<2x128xf32>
    %120 = arith.truncf %82 : vector<2x32xf32> to vector<2x32xbf16>
    %cst_51 = arith.constant dense<0.000000e+00> : vector<2x128xf32>
    %121 = tpu.matmul %120, %11, %cst_51 {dimension_numbers = #tpu.dot_dimension_numbers<[1], [0], [0], [1], [0, 0, 1, 1], [], []>} : vector<2x32xbf16>, vector<32x128xbf16>, vector<2x128xf32> -> vector<2x128xf32>
    %122 = arith.addf %119, %121 : vector<2x128xf32>
    %123 = vector.extract_strided_slice %122 {offsets = [0, 0], sizes = [2, 32], strides = [1, 1]} : vector<2x128xf32> to vector<2x32xf32>
    %124 = arith.negf %123 : vector<2x32xf32>
    %125 = math.exp %124 : vector<2x32xf32>
    %cst_52 = arith.constant 1.000000e+00 : f32
    %126 = vector.broadcast %cst_52 : f32 to vector<2x32xf32>
    %127 = arith.addf %126, %125 : vector<2x32xf32>
    %128 = arith.divf %126, %127 : vector<2x32xf32>
    %129 = vector.extract_strided_slice %122 {offsets = [0, 32], sizes = [2, 32], strides = [1, 1]} : vector<2x128xf32> to vector<2x32xf32>
    %130 = arith.negf %129 : vector<2x32xf32>
    %131 = math.exp %130 : vector<2x32xf32>
    %cst_53 = arith.constant 1.000000e+00 : f32
    %132 = vector.broadcast %cst_53 : f32 to vector<2x32xf32>
    %133 = arith.addf %132, %131 : vector<2x32xf32>
    %134 = arith.divf %132, %133 : vector<2x32xf32>
    %135 = vector.extract_strided_slice %122 {offsets = [0, 64], sizes = [2, 32], strides = [1, 1]} : vector<2x128xf32> to vector<2x32xf32>
    %136 = math.tanh %135 : vector<2x32xf32>
    %137 = vector.extract_strided_slice %122 {offsets = [0, 96], sizes = [2, 32], strides = [1, 1]} : vector<2x128xf32> to vector<2x32xf32>
    %138 = arith.negf %137 : vector<2x32xf32>
    %139 = math.exp %138 : vector<2x32xf32>
    %cst_54 = arith.constant 1.000000e+00 : f32
    %140 = vector.broadcast %cst_54 : f32 to vector<2x32xf32>
    %141 = arith.addf %140, %139 : vector<2x32xf32>
    %142 = arith.divf %140, %141 : vector<2x32xf32>
    %143 = arith.mulf %134, %80 : vector<2x32xf32>
    %144 = arith.mulf %128, %136 : vector<2x32xf32>
    %145 = arith.addf %143, %144 : vector<2x32xf32>
    %146 = math.tanh %145 : vector<2x32xf32>
    %147 = arith.mulf %142, %146 : vector<2x32xf32>
    %c1_55 = arith.constant 1 : index
    %c0_56 = arith.constant 0 : index
    %c0_57 = arith.constant 0 : index
    %148 = vector.load %arg15[%c1_55, %c0_56, %c0_57] : memref<8x2x32xf32, #tpu.memory_space<vmem>>, vector<1x2x32xf32>
    %149 = vector.shape_cast %148 : vector<1x2x32xf32> to vector<2x32xf32>
    %150 = vector.shape_cast %147 : vector<2x32xf32> to vector<1x2x32xf32>
    tpu.vector_store %arg15[%c1_55, %c0_56, %c0_57], %150 {strides = array<i32>} : memref<8x2x32xf32, #tpu.memory_space<vmem>>, vector<1x2x32xf32>,
    %c2 = arith.constant 2 : index
    %c0_58 = arith.constant 0 : index
    %c0_59 = arith.constant 0 : index
    %151 = vector.load %arg14[%c2, %c0_58, %c0_59] : memref<8x2x128xf32, #tpu.memory_space<vmem>>, vector<1x2x128xf32>
    %152 = vector.shape_cast %151 : vector<1x2x128xf32> to vector<2x128xf32>
    %153 = arith.truncf %115 : vector<2x32xf32> to vector<2x32xbf16>
    %cst_60 = arith.constant dense<0.000000e+00> : vector<2x128xf32>
    %154 = tpu.matmul %153, %9, %cst_60 {dimension_numbers = #tpu.dot_dimension_numbers<[1], [0], [0], [1], [0, 0, 1, 1], [], []>} : vector<2x32xbf16>, vector<32x128xbf16>, vector<2x128xf32> -> vector<2x128xf32>
    %155 = arith.addf %152, %154 : vector<2x128xf32>
    %156 = vector.extract_strided_slice %155 {offsets = [0, 0], sizes = [2, 32], strides = [1, 1]} : vector<2x128xf32> to vector<2x32xf32>
    %157 = arith.negf %156 : vector<2x32xf32>
    %158 = math.exp %157 : vector<2x32xf32>
    %cst_61 = arith.constant 1.000000e+00 : f32
    %159 = vector.broadcast %cst_61 : f32 to vector<2x32xf32>
    %160 = arith.addf %159, %158 : vector<2x32xf32>
    %161 = arith.divf %159, %160 : vector<2x32xf32>
    %162 = vector.extract_strided_slice %155 {offsets = [0, 32], sizes = [2, 32], strides = [1, 1]} : vector<2x128xf32> to vector<2x32xf32>
    %163 = arith.negf %162 : vector<2x32xf32>
    %164 = math.exp %163 : vector<2x32xf32>
    %cst_62 = arith.constant 1.000000e+00 : f32
    %165 = vector.broadcast %cst_62 : f32 to vector<2x32xf32>
    %166 = arith.addf %165, %164 : vector<2x32xf32>
    %167 = arith.divf %165, %166 : vector<2x32xf32>
    %168 = vector.extract_strided_slice %155 {offsets = [0, 64], sizes = [2, 32], strides = [1, 1]} : vector<2x128xf32> to vector<2x32xf32>
    %169 = math.tanh %168 : vector<2x32xf32>
    %170 = vector.extract_strided_slice %155 {offsets = [0, 96], sizes = [2, 32], strides = [1, 1]} : vector<2x128xf32> to vector<2x32xf32>
    %171 = arith.negf %170 : vector<2x32xf32>
    %172 = math.exp %171 : vector<2x32xf32>
    %cst_63 = arith.constant 1.000000e+00 : f32
    %173 = vector.broadcast %cst_63 : f32 to vector<2x32xf32>
    %174 = arith.addf %173, %172 : vector<2x32xf32>
    %175 = arith.divf %173, %174 : vector<2x32xf32>
    %176 = arith.mulf %167, %113 : vector<2x32xf32>
    %177 = arith.mulf %161, %169 : vector<2x32xf32>
    %178 = arith.addf %176, %177 : vector<2x32xf32>
    %179 = math.tanh %178 : vector<2x32xf32>
    %180 = arith.mulf %175, %179 : vector<2x32xf32>
    %181 = arith.truncf %180 : vector<2x32xf32> to vector<2x32xbf16>
    %cst_64 = arith.constant dense<0.000000e+00> : vector<2x128xf32>
    %182 = tpu.matmul %181, %10, %cst_64 {dimension_numbers = #tpu.dot_dimension_numbers<[1], [0], [0], [1], [0, 0, 1, 1], [], []>} : vector<2x32xbf16>, vector<32x128xbf16>, vector<2x128xf32> -> vector<2x128xf32>
    %183 = vector.broadcast %12 : vector<1x128xf32> to vector<2x128xf32>
    %184 = arith.addf %182, %183 : vector<2x128xf32>
    %185 = arith.truncf %147 : vector<2x32xf32> to vector<2x32xbf16>
    %cst_65 = arith.constant dense<0.000000e+00> : vector<2x128xf32>
    %186 = tpu.matmul %185, %11, %cst_65 {dimension_numbers = #tpu.dot_dimension_numbers<[1], [0], [0], [1], [0, 0, 1, 1], [], []>} : vector<2x32xbf16>, vector<32x128xbf16>, vector<2x128xf32> -> vector<2x128xf32>
    %187 = arith.addf %184, %186 : vector<2x128xf32>
    %188 = vector.extract_strided_slice %187 {offsets = [0, 0], sizes = [2, 32], strides = [1, 1]} : vector<2x128xf32> to vector<2x32xf32>
    %189 = arith.negf %188 : vector<2x32xf32>
    %190 = math.exp %189 : vector<2x32xf32>
    %cst_66 = arith.constant 1.000000e+00 : f32
    %191 = vector.broadcast %cst_66 : f32 to vector<2x32xf32>
    %192 = arith.addf %191, %190 : vector<2x32xf32>
    %193 = arith.divf %191, %192 : vector<2x32xf32>
    %194 = vector.extract_strided_slice %187 {offsets = [0, 32], sizes = [2, 32], strides = [1, 1]} : vector<2x128xf32> to vector<2x32xf32>
    %195 = arith.negf %194 : vector<2x32xf32>
    %196 = math.exp %195 : vector<2x32xf32>
    %cst_67 = arith.constant 1.000000e+00 : f32
    %197 = vector.broadcast %cst_67 : f32 to vector<2x32xf32>
    %198 = arith.addf %197, %196 : vector<2x32xf32>
    %199 = arith.divf %197, %198 : vector<2x32xf32>
    %200 = vector.extract_strided_slice %187 {offsets = [0, 64], sizes = [2, 32], strides = [1, 1]} : vector<2x128xf32> to vector<2x32xf32>
    %201 = math.tanh %200 : vector<2x32xf32>
    %202 = vector.extract_strided_slice %187 {offsets = [0, 96], sizes = [2, 32], strides = [1, 1]} : vector<2x128xf32> to vector<2x32xf32>
    %203 = arith.negf %202 : vector<2x32xf32>
    %204 = math.exp %203 : vector<2x32xf32>
    %cst_68 = arith.constant 1.000000e+00 : f32
    %205 = vector.broadcast %cst_68 : f32 to vector<2x32xf32>
    %206 = arith.addf %205, %204 : vector<2x32xf32>
    %207 = arith.divf %205, %206 : vector<2x32xf32>
    %208 = arith.mulf %199, %145 : vector<2x32xf32>
    %209 = arith.mulf %193, %201 : vector<2x32xf32>
    %210 = arith.addf %208, %209 : vector<2x32xf32>
    %211 = math.tanh %210 : vector<2x32xf32>
    %212 = arith.mulf %207, %211 : vector<2x32xf32>
    %c2_69 = arith.constant 2 : index
    %c0_70 = arith.constant 0 : index
    %c0_71 = arith.constant 0 : index
    %213 = vector.load %arg15[%c2_69, %c0_70, %c0_71] : memref<8x2x32xf32, #tpu.memory_space<vmem>>, vector<1x2x32xf32>
    %214 = vector.shape_cast %213 : vector<1x2x32xf32> to vector<2x32xf32>
    %215 = vector.shape_cast %212 : vector<2x32xf32> to vector<1x2x32xf32>
    tpu.vector_store %arg15[%c2_69, %c0_70, %c0_71], %215 {strides = array<i32>} : memref<8x2x32xf32, #tpu.memory_space<vmem>>, vector<1x2x32xf32>,
    %c3 = arith.constant 3 : index
    %c0_72 = arith.constant 0 : index
    %c0_73 = arith.constant 0 : index
    %216 = vector.load %arg14[%c3, %c0_72, %c0_73] : memref<8x2x128xf32, #tpu.memory_space<vmem>>, vector<1x2x128xf32>
    %217 = vector.shape_cast %216 : vector<1x2x128xf32> to vector<2x128xf32>
    %218 = arith.truncf %180 : vector<2x32xf32> to vector<2x32xbf16>
    %cst_74 = arith.constant dense<0.000000e+00> : vector<2x128xf32>
    %219 = tpu.matmul %218, %9, %cst_74 {dimension_numbers = #tpu.dot_dimension_numbers<[1], [0], [0], [1], [0, 0, 1, 1], [], []>} : vector<2x32xbf16>, vector<32x128xbf16>, vector<2x128xf32> -> vector<2x128xf32>
    %220 = arith.addf %217, %219 : vector<2x128xf32>
    %221 = vector.extract_strided_slice %220 {offsets = [0, 0], sizes = [2, 32], strides = [1, 1]} : vector<2x128xf32> to vector<2x32xf32>
    %222 = arith.negf %221 : vector<2x32xf32>
    %223 = math.exp %222 : vector<2x32xf32>
    %cst_75 = arith.constant 1.000000e+00 : f32
    %224 = vector.broadcast %cst_75 : f32 to vector<2x32xf32>
    %225 = arith.addf %224, %223 : vector<2x32xf32>
    %226 = arith.divf %224, %225 : vector<2x32xf32>
    %227 = vector.extract_strided_slice %220 {offsets = [0, 32], sizes = [2, 32], strides = [1, 1]} : vector<2x128xf32> to vector<2x32xf32>
    %228 = arith.negf %227 : vector<2x32xf32>
    %229 = math.exp %228 : vector<2x32xf32>
    %cst_76 = arith.constant 1.000000e+00 : f32
    %230 = vector.broadcast %cst_76 : f32 to vector<2x32xf32>
    %231 = arith.addf %230, %229 : vector<2x32xf32>
    %232 = arith.divf %230, %231 : vector<2x32xf32>
    %233 = vector.extract_strided_slice %220 {offsets = [0, 64], sizes = [2, 32], strides = [1, 1]} : vector<2x128xf32> to vector<2x32xf32>
    %234 = math.tanh %233 : vector<2x32xf32>
    %235 = vector.extract_strided_slice %220 {offsets = [0, 96], sizes = [2, 32], strides = [1, 1]} : vector<2x128xf32> to vector<2x32xf32>
    %236 = arith.negf %235 : vector<2x32xf32>
    %237 = math.exp %236 : vector<2x32xf32>
    %cst_77 = arith.constant 1.000000e+00 : f32
    %238 = vector.broadcast %cst_77 : f32 to vector<2x32xf32>
    %239 = arith.addf %238, %237 : vector<2x32xf32>
    %240 = arith.divf %238, %239 : vector<2x32xf32>
    %241 = arith.mulf %232, %178 : vector<2x32xf32>
    %242 = arith.mulf %226, %234 : vector<2x32xf32>
    %243 = arith.addf %241, %242 : vector<2x32xf32>
    %244 = math.tanh %243 : vector<2x32xf32>
    %245 = arith.mulf %240, %244 : vector<2x32xf32>
    %246 = arith.truncf %245 : vector<2x32xf32> to vector<2x32xbf16>
    %cst_78 = arith.constant dense<0.000000e+00> : vector<2x128xf32>
    %247 = tpu.matmul %246, %10, %cst_78 {dimension_numbers = #tpu.dot_dimension_numbers<[1], [0], [0], [1], [0, 0, 1, 1], [], []>} : vector<2x32xbf16>, vector<32x128xbf16>, vector<2x128xf32> -> vector<2x128xf32>
    %248 = vector.broadcast %12 : vector<1x128xf32> to vector<2x128xf32>
    %249 = arith.addf %247, %248 : vector<2x128xf32>
    %250 = arith.truncf %212 : vector<2x32xf32> to vector<2x32xbf16>
    %cst_79 = arith.constant dense<0.000000e+00> : vector<2x128xf32>
    %251 = tpu.matmul %250, %11, %cst_79 {dimension_numbers = #tpu.dot_dimension_numbers<[1], [0], [0], [1], [0, 0, 1, 1], [], []>} : vector<2x32xbf16>, vector<32x128xbf16>, vector<2x128xf32> -> vector<2x128xf32>
    %252 = arith.addf %249, %251 : vector<2x128xf32>
    %253 = vector.extract_strided_slice %252 {offsets = [0, 0], sizes = [2, 32], strides = [1, 1]} : vector<2x128xf32> to vector<2x32xf32>
    %254 = arith.negf %253 : vector<2x32xf32>
    %255 = math.exp %254 : vector<2x32xf32>
    %cst_80 = arith.constant 1.000000e+00 : f32
    %256 = vector.broadcast %cst_80 : f32 to vector<2x32xf32>
    %257 = arith.addf %256, %255 : vector<2x32xf32>
    %258 = arith.divf %256, %257 : vector<2x32xf32>
    %259 = vector.extract_strided_slice %252 {offsets = [0, 32], sizes = [2, 32], strides = [1, 1]} : vector<2x128xf32> to vector<2x32xf32>
    %260 = arith.negf %259 : vector<2x32xf32>
    %261 = math.exp %260 : vector<2x32xf32>
    %cst_81 = arith.constant 1.000000e+00 : f32
    %262 = vector.broadcast %cst_81 : f32 to vector<2x32xf32>
    %263 = arith.addf %262, %261 : vector<2x32xf32>
    %264 = arith.divf %262, %263 : vector<2x32xf32>
    %265 = vector.extract_strided_slice %252 {offsets = [0, 64], sizes = [2, 32], strides = [1, 1]} : vector<2x128xf32> to vector<2x32xf32>
    %266 = math.tanh %265 : vector<2x32xf32>
    %267 = vector.extract_strided_slice %252 {offsets = [0, 96], sizes = [2, 32], strides = [1, 1]} : vector<2x128xf32> to vector<2x32xf32>
    %268 = arith.negf %267 : vector<2x32xf32>
    %269 = math.exp %268 : vector<2x32xf32>
    %cst_82 = arith.constant 1.000000e+00 : f32
    %270 = vector.broadcast %cst_82 : f32 to vector<2x32xf32>
    %271 = arith.addf %270, %269 : vector<2x32xf32>
    %272 = arith.divf %270, %271 : vector<2x32xf32>
    %273 = arith.mulf %264, %210 : vector<2x32xf32>
    %274 = arith.mulf %258, %266 : vector<2x32xf32>
    %275 = arith.addf %273, %274 : vector<2x32xf32>
    %276 = math.tanh %275 : vector<2x32xf32>
    %277 = arith.mulf %272, %276 : vector<2x32xf32>
    %c3_83 = arith.constant 3 : index
    %c0_84 = arith.constant 0 : index
    %c0_85 = arith.constant 0 : index
    %278 = vector.load %arg15[%c3_83, %c0_84, %c0_85] : memref<8x2x32xf32, #tpu.memory_space<vmem>>, vector<1x2x32xf32>
    %279 = vector.shape_cast %278 : vector<1x2x32xf32> to vector<2x32xf32>
    %280 = vector.shape_cast %277 : vector<2x32xf32> to vector<1x2x32xf32>
    tpu.vector_store %arg15[%c3_83, %c0_84, %c0_85], %280 {strides = array<i32>} : memref<8x2x32xf32, #tpu.memory_space<vmem>>, vector<1x2x32xf32>,
    %c4 = arith.constant 4 : index
    %c0_86 = arith.constant 0 : index
    %c0_87 = arith.constant 0 : index
    %281 = vector.load %arg14[%c4, %c0_86, %c0_87] : memref<8x2x128xf32, #tpu.memory_space<vmem>>, vector<1x2x128xf32>
    %282 = vector.shape_cast %281 : vector<1x2x128xf32> to vector<2x128xf32>
    %283 = arith.truncf %245 : vector<2x32xf32> to vector<2x32xbf16>
    %cst_88 = arith.constant dense<0.000000e+00> : vector<2x128xf32>
    %284 = tpu.matmul %283, %9, %cst_88 {dimension_numbers = #tpu.dot_dimension_numbers<[1], [0], [0], [1], [0, 0, 1, 1], [], []>} : vector<2x32xbf16>, vector<32x128xbf16>, vector<2x128xf32> -> vector<2x128xf32>
    %285 = arith.addf %282, %284 : vector<2x128xf32>
    %286 = vector.extract_strided_slice %285 {offsets = [0, 0], sizes = [2, 32], strides = [1, 1]} : vector<2x128xf32> to vector<2x32xf32>
    %287 = arith.negf %286 : vector<2x32xf32>
    %288 = math.exp %287 : vector<2x32xf32>
    %cst_89 = arith.constant 1.000000e+00 : f32
    %289 = vector.broadcast %cst_89 : f32 to vector<2x32xf32>
    %290 = arith.addf %289, %288 : vector<2x32xf32>
    %291 = arith.divf %289, %290 : vector<2x32xf32>
    %292 = vector.extract_strided_slice %285 {offsets = [0, 32], sizes = [2, 32], strides = [1, 1]} : vector<2x128xf32> to vector<2x32xf32>
    %293 = arith.negf %292 : vector<2x32xf32>
    %294 = math.exp %293 : vector<2x32xf32>
    %cst_90 = arith.constant 1.000000e+00 : f32
    %295 = vector.broadcast %cst_90 : f32 to vector<2x32xf32>
    %296 = arith.addf %295, %294 : vector<2x32xf32>
    %297 = arith.divf %295, %296 : vector<2x32xf32>
    %298 = vector.extract_strided_slice %285 {offsets = [0, 64], sizes = [2, 32], strides = [1, 1]} : vector<2x128xf32> to vector<2x32xf32>
    %299 = math.tanh %298 : vector<2x32xf32>
    %300 = vector.extract_strided_slice %285 {offsets = [0, 96], sizes = [2, 32], strides = [1, 1]} : vector<2x128xf32> to vector<2x32xf32>
    %301 = arith.negf %300 : vector<2x32xf32>
    %302 = math.exp %301 : vector<2x32xf32>
    %cst_91 = arith.constant 1.000000e+00 : f32
    %303 = vector.broadcast %cst_91 : f32 to vector<2x32xf32>
    %304 = arith.addf %303, %302 : vector<2x32xf32>
    %305 = arith.divf %303, %304 : vector<2x32xf32>
    %306 = arith.mulf %297, %243 : vector<2x32xf32>
    %307 = arith.mulf %291, %299 : vector<2x32xf32>
    %308 = arith.addf %306, %307 : vector<2x32xf32>
    %309 = math.tanh %308 : vector<2x32xf32>
    %310 = arith.mulf %305, %309 : vector<2x32xf32>
    %311 = arith.truncf %310 : vector<2x32xf32> to vector<2x32xbf16>
    %cst_92 = arith.constant dense<0.000000e+00> : vector<2x128xf32>
    %312 = tpu.matmul %311, %10, %cst_92 {dimension_numbers = #tpu.dot_dimension_numbers<[1], [0], [0], [1], [0, 0, 1, 1], [], []>} : vector<2x32xbf16>, vector<32x128xbf16>, vector<2x128xf32> -> vector<2x128xf32>
    %313 = vector.broadcast %12 : vector<1x128xf32> to vector<2x128xf32>
    %314 = arith.addf %312, %313 : vector<2x128xf32>
    %315 = arith.truncf %277 : vector<2x32xf32> to vector<2x32xbf16>
    %cst_93 = arith.constant dense<0.000000e+00> : vector<2x128xf32>
    %316 = tpu.matmul %315, %11, %cst_93 {dimension_numbers = #tpu.dot_dimension_numbers<[1], [0], [0], [1], [0, 0, 1, 1], [], []>} : vector<2x32xbf16>, vector<32x128xbf16>, vector<2x128xf32> -> vector<2x128xf32>
    %317 = arith.addf %314, %316 : vector<2x128xf32>
    %318 = vector.extract_strided_slice %317 {offsets = [0, 0], sizes = [2, 32], strides = [1, 1]} : vector<2x128xf32> to vector<2x32xf32>
    %319 = arith.negf %318 : vector<2x32xf32>
    %320 = math.exp %319 : vector<2x32xf32>
    %cst_94 = arith.constant 1.000000e+00 : f32
    %321 = vector.broadcast %cst_94 : f32 to vector<2x32xf32>
    %322 = arith.addf %321, %320 : vector<2x32xf32>
    %323 = arith.divf %321, %322 : vector<2x32xf32>
    %324 = vector.extract_strided_slice %317 {offsets = [0, 32], sizes = [2, 32], strides = [1, 1]} : vector<2x128xf32> to vector<2x32xf32>
    %325 = arith.negf %324 : vector<2x32xf32>
    %326 = math.exp %325 : vector<2x32xf32>
    %cst_95 = arith.constant 1.000000e+00 : f32
    %327 = vector.broadcast %cst_95 : f32 to vector<2x32xf32>
    %328 = arith.addf %327, %326 : vector<2x32xf32>
    %329 = arith.divf %327, %328 : vector<2x32xf32>
    %330 = vector.extract_strided_slice %317 {offsets = [0, 64], sizes = [2, 32], strides = [1, 1]} : vector<2x128xf32> to vector<2x32xf32>
    %331 = math.tanh %330 : vector<2x32xf32>
    %332 = vector.extract_strided_slice %317 {offsets = [0, 96], sizes = [2, 32], strides = [1, 1]} : vector<2x128xf32> to vector<2x32xf32>
    %333 = arith.negf %332 : vector<2x32xf32>
    %334 = math.exp %333 : vector<2x32xf32>
    %cst_96 = arith.constant 1.000000e+00 : f32
    %335 = vector.broadcast %cst_96 : f32 to vector<2x32xf32>
    %336 = arith.addf %335, %334 : vector<2x32xf32>
    %337 = arith.divf %335, %336 : vector<2x32xf32>
    %338 = arith.mulf %329, %275 : vector<2x32xf32>
    %339 = arith.mulf %323, %331 : vector<2x32xf32>
    %340 = arith.addf %338, %339 : vector<2x32xf32>
    %341 = math.tanh %340 : vector<2x32xf32>
    %342 = arith.mulf %337, %341 : vector<2x32xf32>
    %c4_97 = arith.constant 4 : index
    %c0_98 = arith.constant 0 : index
    %c0_99 = arith.constant 0 : index
    %343 = vector.load %arg15[%c4_97, %c0_98, %c0_99] : memref<8x2x32xf32, #tpu.memory_space<vmem>>, vector<1x2x32xf32>
    %344 = vector.shape_cast %343 : vector<1x2x32xf32> to vector<2x32xf32>
    %345 = vector.shape_cast %342 : vector<2x32xf32> to vector<1x2x32xf32>
    tpu.vector_store %arg15[%c4_97, %c0_98, %c0_99], %345 {strides = array<i32>} : memref<8x2x32xf32, #tpu.memory_space<vmem>>, vector<1x2x32xf32>,
    %c5 = arith.constant 5 : index
    %c0_100 = arith.constant 0 : index
    %c0_101 = arith.constant 0 : index
    %346 = vector.load %arg14[%c5, %c0_100, %c0_101] : memref<8x2x128xf32, #tpu.memory_space<vmem>>, vector<1x2x128xf32>
    %347 = vector.shape_cast %346 : vector<1x2x128xf32> to vector<2x128xf32>
    %348 = arith.truncf %310 : vector<2x32xf32> to vector<2x32xbf16>
    %cst_102 = arith.constant dense<0.000000e+00> : vector<2x128xf32>
    %349 = tpu.matmul %348, %9, %cst_102 {dimension_numbers = #tpu.dot_dimension_numbers<[1], [0], [0], [1], [0, 0, 1, 1], [], []>} : vector<2x32xbf16>, vector<32x128xbf16>, vector<2x128xf32> -> vector<2x128xf32>
    %350 = arith.addf %347, %349 : vector<2x128xf32>
    %351 = vector.extract_strided_slice %350 {offsets = [0, 0], sizes = [2, 32], strides = [1, 1]} : vector<2x128xf32> to vector<2x32xf32>
    %352 = arith.negf %351 : vector<2x32xf32>
    %353 = math.exp %352 : vector<2x32xf32>
    %cst_103 = arith.constant 1.000000e+00 : f32
    %354 = vector.broadcast %cst_103 : f32 to vector<2x32xf32>
    %355 = arith.addf %354, %353 : vector<2x32xf32>
    %356 = arith.divf %354, %355 : vector<2x32xf32>
    %357 = vector.extract_strided_slice %350 {offsets = [0, 32], sizes = [2, 32], strides = [1, 1]} : vector<2x128xf32> to vector<2x32xf32>
    %358 = arith.negf %357 : vector<2x32xf32>
    %359 = math.exp %358 : vector<2x32xf32>
    %cst_104 = arith.constant 1.000000e+00 : f32
    %360 = vector.broadcast %cst_104 : f32 to vector<2x32xf32>
    %361 = arith.addf %360, %359 : vector<2x32xf32>
    %362 = arith.divf %360, %361 : vector<2x32xf32>
    %363 = vector.extract_strided_slice %350 {offsets = [0, 64], sizes = [2, 32], strides = [1, 1]} : vector<2x128xf32> to vector<2x32xf32>
    %364 = math.tanh %363 : vector<2x32xf32>
    %365 = vector.extract_strided_slice %350 {offsets = [0, 96], sizes = [2, 32], strides = [1, 1]} : vector<2x128xf32> to vector<2x32xf32>
    %366 = arith.negf %365 : vector<2x32xf32>
    %367 = math.exp %366 : vector<2x32xf32>
    %cst_105 = arith.constant 1.000000e+00 : f32
    %368 = vector.broadcast %cst_105 : f32 to vector<2x32xf32>
    %369 = arith.addf %368, %367 : vector<2x32xf32>
    %370 = arith.divf %368, %369 : vector<2x32xf32>
    %371 = arith.mulf %362, %308 : vector<2x32xf32>
    %372 = arith.mulf %356, %364 : vector<2x32xf32>
    %373 = arith.addf %371, %372 : vector<2x32xf32>
    %374 = math.tanh %373 : vector<2x32xf32>
    %375 = arith.mulf %370, %374 : vector<2x32xf32>
    %376 = arith.truncf %375 : vector<2x32xf32> to vector<2x32xbf16>
    %cst_106 = arith.constant dense<0.000000e+00> : vector<2x128xf32>
    %377 = tpu.matmul %376, %10, %cst_106 {dimension_numbers = #tpu.dot_dimension_numbers<[1], [0], [0], [1], [0, 0, 1, 1], [], []>} : vector<2x32xbf16>, vector<32x128xbf16>, vector<2x128xf32> -> vector<2x128xf32>
    %378 = vector.broadcast %12 : vector<1x128xf32> to vector<2x128xf32>
    %379 = arith.addf %377, %378 : vector<2x128xf32>
    %380 = arith.truncf %342 : vector<2x32xf32> to vector<2x32xbf16>
    %cst_107 = arith.constant dense<0.000000e+00> : vector<2x128xf32>
    %381 = tpu.matmul %380, %11, %cst_107 {dimension_numbers = #tpu.dot_dimension_numbers<[1], [0], [0], [1], [0, 0, 1, 1], [], []>} : vector<2x32xbf16>, vector<32x128xbf16>, vector<2x128xf32> -> vector<2x128xf32>
    %382 = arith.addf %379, %381 : vector<2x128xf32>
    %383 = vector.extract_strided_slice %382 {offsets = [0, 0], sizes = [2, 32], strides = [1, 1]} : vector<2x128xf32> to vector<2x32xf32>
    %384 = arith.negf %383 : vector<2x32xf32>
    %385 = math.exp %384 : vector<2x32xf32>
    %cst_108 = arith.constant 1.000000e+00 : f32
    %386 = vector.broadcast %cst_108 : f32 to vector<2x32xf32>
    %387 = arith.addf %386, %385 : vector<2x32xf32>
    %388 = arith.divf %386, %387 : vector<2x32xf32>
    %389 = vector.extract_strided_slice %382 {offsets = [0, 32], sizes = [2, 32], strides = [1, 1]} : vector<2x128xf32> to vector<2x32xf32>
    %390 = arith.negf %389 : vector<2x32xf32>
    %391 = math.exp %390 : vector<2x32xf32>
    %cst_109 = arith.constant 1.000000e+00 : f32
    %392 = vector.broadcast %cst_109 : f32 to vector<2x32xf32>
    %393 = arith.addf %392, %391 : vector<2x32xf32>
    %394 = arith.divf %392, %393 : vector<2x32xf32>
    %395 = vector.extract_strided_slice %382 {offsets = [0, 64], sizes = [2, 32], strides = [1, 1]} : vector<2x128xf32> to vector<2x32xf32>
    %396 = math.tanh %395 : vector<2x32xf32>
    %397 = vector.extract_strided_slice %382 {offsets = [0, 96], sizes = [2, 32], strides = [1, 1]} : vector<2x128xf32> to vector<2x32xf32>
    %398 = arith.negf %397 : vector<2x32xf32>
    %399 = math.exp %398 : vector<2x32xf32>
    %cst_110 = arith.constant 1.000000e+00 : f32
    %400 = vector.broadcast %cst_110 : f32 to vector<2x32xf32>
    %401 = arith.addf %400, %399 : vector<2x32xf32>
    %402 = arith.divf %400, %401 : vector<2x32xf32>
    %403 = arith.mulf %394, %340 : vector<2x32xf32>
    %404 = arith.mulf %388, %396 : vector<2x32xf32>
    %405 = arith.addf %403, %404 : vector<2x32xf32>
    %406 = math.tanh %405 : vector<2x32xf32>
    %407 = arith.mulf %402, %406 : vector<2x32xf32>
    %c5_111 = arith.constant 5 : index
    %c0_112 = arith.constant 0 : index
    %c0_113 = arith.constant 0 : index
    %408 = vector.load %arg15[%c5_111, %c0_112, %c0_113] : memref<8x2x32xf32, #tpu.memory_space<vmem>>, vector<1x2x32xf32>
    %409 = vector.shape_cast %408 : vector<1x2x32xf32> to vector<2x32xf32>
    %410 = vector.shape_cast %407 : vector<2x32xf32> to vector<1x2x32xf32>
    tpu.vector_store %arg15[%c5_111, %c0_112, %c0_113], %410 {strides = array<i32>} : memref<8x2x32xf32, #tpu.memory_space<vmem>>, vector<1x2x32xf32>,
    %c6 = arith.constant 6 : index
    %c0_114 = arith.constant 0 : index
    %c0_115 = arith.constant 0 : index
    %411 = vector.load %arg14[%c6, %c0_114, %c0_115] : memref<8x2x128xf32, #tpu.memory_space<vmem>>, vector<1x2x128xf32>
    %412 = vector.shape_cast %411 : vector<1x2x128xf32> to vector<2x128xf32>
    %413 = arith.truncf %375 : vector<2x32xf32> to vector<2x32xbf16>
    %cst_116 = arith.constant dense<0.000000e+00> : vector<2x128xf32>
    %414 = tpu.matmul %413, %9, %cst_116 {dimension_numbers = #tpu.dot_dimension_numbers<[1], [0], [0], [1], [0, 0, 1, 1], [], []>} : vector<2x32xbf16>, vector<32x128xbf16>, vector<2x128xf32> -> vector<2x128xf32>
    %415 = arith.addf %412, %414 : vector<2x128xf32>
    %416 = vector.extract_strided_slice %415 {offsets = [0, 0], sizes = [2, 32], strides = [1, 1]} : vector<2x128xf32> to vector<2x32xf32>
    %417 = arith.negf %416 : vector<2x32xf32>
    %418 = math.exp %417 : vector<2x32xf32>
    %cst_117 = arith.constant 1.000000e+00 : f32
    %419 = vector.broadcast %cst_117 : f32 to vector<2x32xf32>
    %420 = arith.addf %419, %418 : vector<2x32xf32>
    %421 = arith.divf %419, %420 : vector<2x32xf32>
    %422 = vector.extract_strided_slice %415 {offsets = [0, 32], sizes = [2, 32], strides = [1, 1]} : vector<2x128xf32> to vector<2x32xf32>
    %423 = arith.negf %422 : vector<2x32xf32>
    %424 = math.exp %423 : vector<2x32xf32>
    %cst_118 = arith.constant 1.000000e+00 : f32
    %425 = vector.broadcast %cst_118 : f32 to vector<2x32xf32>
    %426 = arith.addf %425, %424 : vector<2x32xf32>
    %427 = arith.divf %425, %426 : vector<2x32xf32>
    %428 = vector.extract_strided_slice %415 {offsets = [0, 64], sizes = [2, 32], strides = [1, 1]} : vector<2x128xf32> to vector<2x32xf32>
    %429 = math.tanh %428 : vector<2x32xf32>
    %430 = vector.extract_strided_slice %415 {offsets = [0, 96], sizes = [2, 32], strides = [1, 1]} : vector<2x128xf32> to vector<2x32xf32>
    %431 = arith.negf %430 : vector<2x32xf32>
    %432 = math.exp %431 : vector<2x32xf32>
    %cst_119 = arith.constant 1.000000e+00 : f32
    %433 = vector.broadcast %cst_119 : f32 to vector<2x32xf32>
    %434 = arith.addf %433, %432 : vector<2x32xf32>
    %435 = arith.divf %433, %434 : vector<2x32xf32>
    %436 = arith.mulf %427, %373 : vector<2x32xf32>
    %437 = arith.mulf %421, %429 : vector<2x32xf32>
    %438 = arith.addf %436, %437 : vector<2x32xf32>
    %439 = math.tanh %438 : vector<2x32xf32>
    %440 = arith.mulf %435, %439 : vector<2x32xf32>
    %441 = arith.truncf %440 : vector<2x32xf32> to vector<2x32xbf16>
    %cst_120 = arith.constant dense<0.000000e+00> : vector<2x128xf32>
    %442 = tpu.matmul %441, %10, %cst_120 {dimension_numbers = #tpu.dot_dimension_numbers<[1], [0], [0], [1], [0, 0, 1, 1], [], []>} : vector<2x32xbf16>, vector<32x128xbf16>, vector<2x128xf32> -> vector<2x128xf32>
    %443 = vector.broadcast %12 : vector<1x128xf32> to vector<2x128xf32>
    %444 = arith.addf %442, %443 : vector<2x128xf32>
    %445 = arith.truncf %407 : vector<2x32xf32> to vector<2x32xbf16>
    %cst_121 = arith.constant dense<0.000000e+00> : vector<2x128xf32>
    %446 = tpu.matmul %445, %11, %cst_121 {dimension_numbers = #tpu.dot_dimension_numbers<[1], [0], [0], [1], [0, 0, 1, 1], [], []>} : vector<2x32xbf16>, vector<32x128xbf16>, vector<2x128xf32> -> vector<2x128xf32>
    %447 = arith.addf %444, %446 : vector<2x128xf32>
    %448 = vector.extract_strided_slice %447 {offsets = [0, 0], sizes = [2, 32], strides = [1, 1]} : vector<2x128xf32> to vector<2x32xf32>
    %449 = arith.negf %448 : vector<2x32xf32>
    %450 = math.exp %449 : vector<2x32xf32>
    %cst_122 = arith.constant 1.000000e+00 : f32
    %451 = vector.broadcast %cst_122 : f32 to vector<2x32xf32>
    %452 = arith.addf %451, %450 : vector<2x32xf32>
    %453 = arith.divf %451, %452 : vector<2x32xf32>
    %454 = vector.extract_strided_slice %447 {offsets = [0, 32], sizes = [2, 32], strides = [1, 1]} : vector<2x128xf32> to vector<2x32xf32>
    %455 = arith.negf %454 : vector<2x32xf32>
    %456 = math.exp %455 : vector<2x32xf32>
    %cst_123 = arith.constant 1.000000e+00 : f32
    %457 = vector.broadcast %cst_123 : f32 to vector<2x32xf32>
    %458 = arith.addf %457, %456 : vector<2x32xf32>
    %459 = arith.divf %457, %458 : vector<2x32xf32>
    %460 = vector.extract_strided_slice %447 {offsets = [0, 64], sizes = [2, 32], strides = [1, 1]} : vector<2x128xf32> to vector<2x32xf32>
    %461 = math.tanh %460 : vector<2x32xf32>
    %462 = vector.extract_strided_slice %447 {offsets = [0, 96], sizes = [2, 32], strides = [1, 1]} : vector<2x128xf32> to vector<2x32xf32>
    %463 = arith.negf %462 : vector<2x32xf32>
    %464 = math.exp %463 : vector<2x32xf32>
    %cst_124 = arith.constant 1.000000e+00 : f32
    %465 = vector.broadcast %cst_124 : f32 to vector<2x32xf32>
    %466 = arith.addf %465, %464 : vector<2x32xf32>
    %467 = arith.divf %465, %466 : vector<2x32xf32>
    %468 = arith.mulf %459, %405 : vector<2x32xf32>
    %469 = arith.mulf %453, %461 : vector<2x32xf32>
    %470 = arith.addf %468, %469 : vector<2x32xf32>
    %471 = math.tanh %470 : vector<2x32xf32>
    %472 = arith.mulf %467, %471 : vector<2x32xf32>
    %c6_125 = arith.constant 6 : index
    %c0_126 = arith.constant 0 : index
    %c0_127 = arith.constant 0 : index
    %473 = vector.load %arg15[%c6_125, %c0_126, %c0_127] : memref<8x2x32xf32, #tpu.memory_space<vmem>>, vector<1x2x32xf32>
    %474 = vector.shape_cast %473 : vector<1x2x32xf32> to vector<2x32xf32>
    %475 = vector.shape_cast %472 : vector<2x32xf32> to vector<1x2x32xf32>
    tpu.vector_store %arg15[%c6_125, %c0_126, %c0_127], %475 {strides = array<i32>} : memref<8x2x32xf32, #tpu.memory_space<vmem>>, vector<1x2x32xf32>,
    %c7 = arith.constant 7 : index
    %c0_128 = arith.constant 0 : index
    %c0_129 = arith.constant 0 : index
    %476 = vector.load %arg14[%c7, %c0_128, %c0_129] : memref<8x2x128xf32, #tpu.memory_space<vmem>>, vector<1x2x128xf32>
    %477 = vector.shape_cast %476 : vector<1x2x128xf32> to vector<2x128xf32>
    %478 = arith.truncf %440 : vector<2x32xf32> to vector<2x32xbf16>
    %cst_130 = arith.constant dense<0.000000e+00> : vector<2x128xf32>
    %479 = tpu.matmul %478, %9, %cst_130 {dimension_numbers = #tpu.dot_dimension_numbers<[1], [0], [0], [1], [0, 0, 1, 1], [], []>} : vector<2x32xbf16>, vector<32x128xbf16>, vector<2x128xf32> -> vector<2x128xf32>
    %480 = arith.addf %477, %479 : vector<2x128xf32>
    %481 = vector.extract_strided_slice %480 {offsets = [0, 0], sizes = [2, 32], strides = [1, 1]} : vector<2x128xf32> to vector<2x32xf32>
    %482 = arith.negf %481 : vector<2x32xf32>
    %483 = math.exp %482 : vector<2x32xf32>
    %cst_131 = arith.constant 1.000000e+00 : f32
    %484 = vector.broadcast %cst_131 : f32 to vector<2x32xf32>
    %485 = arith.addf %484, %483 : vector<2x32xf32>
    %486 = arith.divf %484, %485 : vector<2x32xf32>
    %487 = vector.extract_strided_slice %480 {offsets = [0, 32], sizes = [2, 32], strides = [1, 1]} : vector<2x128xf32> to vector<2x32xf32>
    %488 = arith.negf %487 : vector<2x32xf32>
    %489 = math.exp %488 : vector<2x32xf32>
    %cst_132 = arith.constant 1.000000e+00 : f32
    %490 = vector.broadcast %cst_132 : f32 to vector<2x32xf32>
    %491 = arith.addf %490, %489 : vector<2x32xf32>
    %492 = arith.divf %490, %491 : vector<2x32xf32>
    %493 = vector.extract_strided_slice %480 {offsets = [0, 64], sizes = [2, 32], strides = [1, 1]} : vector<2x128xf32> to vector<2x32xf32>
    %494 = math.tanh %493 : vector<2x32xf32>
    %495 = vector.extract_strided_slice %480 {offsets = [0, 96], sizes = [2, 32], strides = [1, 1]} : vector<2x128xf32> to vector<2x32xf32>
    %496 = arith.negf %495 : vector<2x32xf32>
    %497 = math.exp %496 : vector<2x32xf32>
    %cst_133 = arith.constant 1.000000e+00 : f32
    %498 = vector.broadcast %cst_133 : f32 to vector<2x32xf32>
    %499 = arith.addf %498, %497 : vector<2x32xf32>
    %500 = arith.divf %498, %499 : vector<2x32xf32>
    %501 = arith.mulf %492, %438 : vector<2x32xf32>
    %502 = arith.mulf %486, %494 : vector<2x32xf32>
    %503 = arith.addf %501, %502 : vector<2x32xf32>
    %504 = math.tanh %503 : vector<2x32xf32>
    %505 = arith.mulf %500, %504 : vector<2x32xf32>
    %506 = arith.truncf %505 : vector<2x32xf32> to vector<2x32xbf16>
    %cst_134 = arith.constant dense<0.000000e+00> : vector<2x128xf32>
    %507 = tpu.matmul %506, %10, %cst_134 {dimension_numbers = #tpu.dot_dimension_numbers<[1], [0], [0], [1], [0, 0, 1, 1], [], []>} : vector<2x32xbf16>, vector<32x128xbf16>, vector<2x128xf32> -> vector<2x128xf32>
    %508 = vector.broadcast %12 : vector<1x128xf32> to vector<2x128xf32>
    %509 = arith.addf %507, %508 : vector<2x128xf32>
    %510 = arith.truncf %472 : vector<2x32xf32> to vector<2x32xbf16>
    %cst_135 = arith.constant dense<0.000000e+00> : vector<2x128xf32>
    %511 = tpu.matmul %510, %11, %cst_135 {dimension_numbers = #tpu.dot_dimension_numbers<[1], [0], [0], [1], [0, 0, 1, 1], [], []>} : vector<2x32xbf16>, vector<32x128xbf16>, vector<2x128xf32> -> vector<2x128xf32>
    %512 = arith.addf %509, %511 : vector<2x128xf32>
    %513 = vector.extract_strided_slice %512 {offsets = [0, 0], sizes = [2, 32], strides = [1, 1]} : vector<2x128xf32> to vector<2x32xf32>
    %514 = arith.negf %513 : vector<2x32xf32>
    %515 = math.exp %514 : vector<2x32xf32>
    %cst_136 = arith.constant 1.000000e+00 : f32
    %516 = vector.broadcast %cst_136 : f32 to vector<2x32xf32>
    %517 = arith.addf %516, %515 : vector<2x32xf32>
    %518 = arith.divf %516, %517 : vector<2x32xf32>
    %519 = vector.extract_strided_slice %512 {offsets = [0, 32], sizes = [2, 32], strides = [1, 1]} : vector<2x128xf32> to vector<2x32xf32>
    %520 = arith.negf %519 : vector<2x32xf32>
    %521 = math.exp %520 : vector<2x32xf32>
    %cst_137 = arith.constant 1.000000e+00 : f32
    %522 = vector.broadcast %cst_137 : f32 to vector<2x32xf32>
    %523 = arith.addf %522, %521 : vector<2x32xf32>
    %524 = arith.divf %522, %523 : vector<2x32xf32>
    %525 = vector.extract_strided_slice %512 {offsets = [0, 64], sizes = [2, 32], strides = [1, 1]} : vector<2x128xf32> to vector<2x32xf32>
    %526 = math.tanh %525 : vector<2x32xf32>
    %527 = vector.extract_strided_slice %512 {offsets = [0, 96], sizes = [2, 32], strides = [1, 1]} : vector<2x128xf32> to vector<2x32xf32>
    %528 = arith.negf %527 : vector<2x32xf32>
    %529 = math.exp %528 : vector<2x32xf32>
    %cst_138 = arith.constant 1.000000e+00 : f32
    %530 = vector.broadcast %cst_138 : f32 to vector<2x32xf32>
    %531 = arith.addf %530, %529 : vector<2x32xf32>
    %532 = arith.divf %530, %531 : vector<2x32xf32>
    %533 = arith.mulf %524, %470 : vector<2x32xf32>
    %534 = arith.mulf %518, %526 : vector<2x32xf32>
    %535 = arith.addf %533, %534 : vector<2x32xf32>
    %536 = math.tanh %535 : vector<2x32xf32>
    %537 = arith.mulf %532, %536 : vector<2x32xf32>
    %c7_139 = arith.constant 7 : index
    %c0_140 = arith.constant 0 : index
    %c0_141 = arith.constant 0 : index
    %538 = vector.load %arg15[%c7_139, %c0_140, %c0_141] : memref<8x2x32xf32, #tpu.memory_space<vmem>>, vector<1x2x32xf32>
    %539 = vector.shape_cast %538 : vector<1x2x32xf32> to vector<2x32xf32>
    %540 = vector.shape_cast %537 : vector<2x32xf32> to vector<1x2x32xf32>
    tpu.vector_store %arg15[%c7_139, %c0_140, %c0_141], %540 {strides = array<i32>} : memref<8x2x32xf32, #tpu.memory_space<vmem>>, vector<1x2x32xf32>,
    %c0_142 = arith.constant 0 : index
    %c0_143 = arith.constant 0 : index
    %c0_144 = arith.constant 0 : index
    %541 = vector.load %arg12[%c0_142, %c0_143, %c0_144] : memref<2x2x32xf32, #tpu.memory_space<vmem>>, vector<1x2x32xf32>
    %542 = vector.shape_cast %541 : vector<1x2x32xf32> to vector<2x32xf32>
    %543 = vector.shape_cast %505 : vector<2x32xf32> to vector<1x2x32xf32>
    tpu.vector_store %arg12[%c0_142, %c0_143, %c0_144], %543 {strides = array<i32>} : memref<2x2x32xf32, #tpu.memory_space<vmem>>, vector<1x2x32xf32>,
    %c0_145 = arith.constant 0 : index
    %c0_146 = arith.constant 0 : index
    %c0_147 = arith.constant 0 : index
    %544 = vector.load %arg13[%c0_145, %c0_146, %c0_147] : memref<2x2x32xf32, #tpu.memory_space<vmem>>, vector<1x2x32xf32>
    %545 = vector.shape_cast %544 : vector<1x2x32xf32> to vector<2x32xf32>
    %546 = vector.shape_cast %503 : vector<2x32xf32> to vector<1x2x32xf32>
    tpu.vector_store %arg13[%c0_145, %c0_146, %c0_147], %546 {strides = array<i32>} : memref<2x2x32xf32, #tpu.memory_space<vmem>>, vector<1x2x32xf32>,
    %c1_148 = arith.constant 1 : index
    %c0_149 = arith.constant 0 : index
    %c0_150 = arith.constant 0 : index
    %547 = vector.load %arg12[%c1_148, %c0_149, %c0_150] : memref<2x2x32xf32, #tpu.memory_space<vmem>>, vector<1x2x32xf32>
    %548 = vector.shape_cast %547 : vector<1x2x32xf32> to vector<2x32xf32>
    %549 = vector.shape_cast %537 : vector<2x32xf32> to vector<1x2x32xf32>
    tpu.vector_store %arg12[%c1_148, %c0_149, %c0_150], %549 {strides = array<i32>} : memref<2x2x32xf32, #tpu.memory_space<vmem>>, vector<1x2x32xf32>,
    %c1_151 = arith.constant 1 : index
    %c0_152 = arith.constant 0 : index
    %c0_153 = arith.constant 0 : index
    %550 = vector.load %arg13[%c1_151, %c0_152, %c0_153] : memref<2x2x32xf32, #tpu.memory_space<vmem>>, vector<1x2x32xf32>
    %551 = vector.shape_cast %550 : vector<1x2x32xf32> to vector<2x32xf32>
    %552 = vector.shape_cast %535 : vector<2x32xf32> to vector<1x2x32xf32>
    tpu.vector_store %arg13[%c1_151, %c0_152, %c0_153], %552 {strides = array<i32>} : memref<2x2x32xf32, #tpu.memory_space<vmem>>, vector<1x2x32xf32>,
    %c0_154 = arith.constant 0 : index
    %c0_155 = arith.constant 0 : index
    %c0_156 = arith.constant 0 : index
    %553 = vector.load %arg15[%c0_154, %c0_155, %c0_156] : memref<8x2x32xf32, #tpu.memory_space<vmem>>, vector<8x2x32xf32>
    %554 = vector.shape_cast %553 : vector<8x2x32xf32> to vector<16x32xf32>
    %555 = arith.truncf %554 : vector<16x32xf32> to vector<16x32xbf16>
    %c0_157 = arith.constant 0 : index
    %c0_158 = arith.constant 0 : index
    %556 = vector.load %arg7[%c0_157, %c0_158] : memref<32x128xbf16, #tpu.memory_space<vmem>>, vector<32x128xbf16>
    %cst_159 = arith.constant dense<0.000000e+00> : vector<16x128xf32>
    %557 = tpu.matmul %555, %556, %cst_159 {dimension_numbers = #tpu.dot_dimension_numbers<[1], [0], [0], [1], [0, 0, 1, 1], [], []>} : vector<16x32xbf16>, vector<32x128xbf16>, vector<16x128xf32> -> vector<16x128xf32>
    %c0_160 = arith.constant 0 : index
    %c0_161 = arith.constant 0 : index
    %558 = vector.load %arg8[%c0_160, %c0_161] : memref<1x128xf32, #tpu.memory_space<vmem>>, vector<1x128xf32>
    %559 = vector.broadcast %558 : vector<1x128xf32> to vector<16x128xf32>
    %560 = arith.addf %557, %559 : vector<16x128xf32>
    %c0_162 = arith.constant 0 : index
    %c0_163 = arith.constant 0 : index
    %561 = vector.load %arg11[%c0_162, %c0_163] : memref<16x128xf32, #tpu.memory_space<vmem>>, vector<16x128xf32>
    tpu.vector_store %arg11[%c0_162, %c0_163], %560 {strides = array<i32>} : memref<16x128xf32, #tpu.memory_space<vmem>>, vector<16x128xf32>,
    return
  }
}

</mosaic_0001>

<bundles_post_ra>
// kernel: tpu_custom_call.1
= control target key start
LH: loop header
LB: loop body
LE: loop exit
PB: predicated region body
PF: predicated region fallthrough
CT: control target
= control target key end

     0   :  { %19 = vsyncpa [#allocation5], 0  ;;  %s2566_s0 = inlined_call_operand.hbm [shape: bf16[8,2,32], index: 0, kind: input, shape index: {}]   ;;  %s2567_s1 = inlined_call_operand.hbm [shape: bf16[32,128], index: 1, kind: input, shape index: {}]   ;;  %s2568_s2 = inlined_call_operand.hbm [shape: bf16[32,128], index: 2, kind: input, shape index: {}]   ;;  %s2569_s3 = inlined_call_operand.hbm [shape: f32[1,128], index: 3, kind: input, shape index: {}]   ;;  %s2570_s4 = inlined_call_operand.hbm [shape: bf16[32,128], index: 4, kind: input, shape index: {}]   ;;  %s2571_s5 = inlined_call_operand.hbm [shape: bf16[32,128], index: 5, kind: input, shape index: {}]   ;;  %s2572_s6 = inlined_call_operand.hbm [shape: f32[1,128], index: 6, kind: input, shape index: {}]   ;;  %s2573_s7 = inlined_call_operand.hbm [shape: bf16[32,128], index: 7, kind: input, shape index: {}]   ;;  %s2574_s8 = inlined_call_operand.hbm [shape: f32[1,128], index: 8, kind: input, shape index: {}]   ;;  %s2575_s9 = inlined_call_operand.vmem [shape: f32[2,2,32], index: 9, kind: input, shape index: {}]   ;;  %s2576_s10 = inlined_call_operand.vmem [shape: f32[2,2,32], index: 10, kind: input, shape index: {}]   ;;  %s2577_s11 = inlined_call_operand.hbm [shape: f32[16,128], index: 11, kind: output, shape index: {0}]   ;;  %s2578_s12 = inlined_call_operand.hbm [shape: f32[2,2,32], index: 12, kind: output, shape index: {1}]   ;;  %s2579_s13 = inlined_call_operand.hbm [shape: f32[2,2,32], index: 13, kind: output, shape index: {2}]  }
   0x1   :  { %20 = vsyncpa [#allocation8], 0 }
   0x2   :  { %21 = vsyncpa [#allocation11], 0 }
   0x3   :  { %22 = vsyncpa [#allocation14], 0 }
   0x4   :  { %23 = vsyncpa [#allocation17], 0 }
   0x5   :  { %24 = vsyncpa [#allocation6], 0  ;;  %s43_s27 = sshll.u32 %s2567_s1, 4  ;;  %s44_s27 = int_to_ptr.hbm [resolvable:$true] %s43_s27 }
   0x6   :  { %25 = vsyncpa [#allocation21], 0  ;;  %s2131_s28 = smov [#allocation7]   ;;  %s70_s15 = sshll.u32 %s2569_s3, 4  ;;  %s71_s15 = int_to_ptr.hbm [resolvable:$true] %s70_s15 }
   0x7   :  { %s45_s29 = sshll.u32 %s2131_s28, 4  ;;  %s2132_s16 = smov 64   ;;  %s46_s29 = int_to_ptr.vmem [resolvable:$true] %s45_s29 }
   0x8   :  { %s2133_s17 = smov 4   ;;  %s2134_s18 = smov [#allocation10]  }
   0x9   :  { %51 = dma.hbm_to_vmem [thread:$0]  %s44_s27, 256, %s46_s29, [#allocation8], %s2132_s16, %s2132_s16, %s2133_s17  }
   0xa   :  { %s72_s19 = sshll.u32 %s2134_s18, 4  ;;  %s93_s21 = sshll.u32 %s2571_s5, 4  ;;  %s73_s19 = int_to_ptr.vmem [resolvable:$true] %s72_s19  ;;  %s94_s21 = int_to_ptr.hbm [resolvable:$true] %s93_s21 }
   0xb   :  { %75 = dma.hbm_to_vmem [thread:$0]  %s71_s15, 16, %s73_s19, [#allocation11]  }
   0xc   :  { %s117_s3 = sshll.u32 %s2573_s7, 4  ;;  %s2135_s24 = smov [#allocation13]   ;;  %s118_s3 = int_to_ptr.hbm [resolvable:$true] %s117_s3 }
   0xd   :  { %s95_s25 = sshll.u32 %s2135_s24, 4  ;;  %s2136_s26 = smov [#allocation16]   ;;  %s96_s25 = int_to_ptr.vmem [resolvable:$true] %s95_s25 }
   0xe   :  { %101 = dma.hbm_to_vmem [thread:$0]  %s94_s21, 256, %s96_s25, [#allocation14], %s2132_s16, %s2132_s16, %s2133_s17  }
   0xf   :  { %s119_s27 = sshll.u32 %s2136_s26, 4  ;;  %s30_s5 = sshll.u32 %s2566_s0, 4  ;;  %s120_s27 = int_to_ptr.vmem [resolvable:$true] %s119_s27  ;;  %s31_s5 = int_to_ptr.hbm [resolvable:$true] %s30_s5 }
  0x10   :  { %125 = dma.hbm_to_vmem [thread:$0]  %s118_s3, 256, %s120_s27, [#allocation17], %s2132_s16, %s2132_s16, %s2133_s17  }
  0x11   :  { %s2137_s7 = smov [#allocation4]   ;;  %s56_s18 = sshll.u32 %s2568_s2, 4  ;;  %s57_s18 = int_to_ptr.hbm [resolvable:$true] %s56_s18 }
  0x12   :  { %s32_s30 = sshll.u32 %s2137_s7, 4  ;;  %s2138_s19 = smov 16   ;;  %s33_s30 = int_to_ptr.vmem [resolvable:$true] %s32_s30 }
  0x13   :  { %s2139_s20 = smov 1   ;;  %s2140_s1 = smov [#allocation9]  }
  0x14   :  { %38 = dma.hbm_to_vmem [thread:$0]  %s31_s5, 128, %s33_s30, [#allocation5], %s2138_s19, %s2138_s19, %s2139_s20  }
  0x15   :  { %s58_s21 = sshll.u32 %s2140_s1, 4  ;;  %s80_s23 = sshll.u32 %s2570_s4, 4  ;;  %s59_s21 = int_to_ptr.vmem [resolvable:$true] %s58_s21  ;;  %s81_s23 = int_to_ptr.hbm [resolvable:$true] %s80_s23 }
  0x16   :  { %64 = dma.hbm_to_vmem [thread:$0]  %s57_s18, 256, %s59_s21, [#allocation8], %s2132_s16, %s2132_s16, %s2133_s17  }
  0x17   :  { %s107_s2 = sshll.u32 %s2572_s6, 4  ;;  %s2141_s25 = smov [#allocation12]   ;;  %s108_s2 = int_to_ptr.hbm [resolvable:$true] %s107_s2 }
  0x18   :  { %s82_s26 = sshll.u32 %s2141_s25, 4  ;;  %s2142_s27 = smov [#allocation15]   ;;  %s83_s26 = int_to_ptr.vmem [resolvable:$true] %s82_s26 }
  0x19   :  { %88 = dma.hbm_to_vmem [thread:$0]  %s81_s23, 256, %s83_s26, [#allocation11], %s2132_s16, %s2132_s16, %s2133_s17  }
  0x1a   :  { %s109_s4 = sshll.u32 %s2142_s27, 4  ;;  %s131_s5 = sshll.u32 %s2574_s8, 4  ;;  %s110_s4 = int_to_ptr.vmem [resolvable:$true] %s109_s4  ;;  %s132_s5 = int_to_ptr.hbm [resolvable:$true] %s131_s5 }
  0x1b   :  { %112 = dma.hbm_to_vmem [thread:$0]  %s108_s2, 16, %s110_s4, [#allocation14]  }
  0x1c   :  { %s2143_s7 = smov [#allocation18]  }
  0x1d   :  { %s133_s30 = sshll.u32 %s2143_s7, 4  ;;  %s134_s30 = int_to_ptr.vmem [resolvable:$true] %s133_s30 }
  0x1e   :  { %136 = dma.hbm_to_vmem [thread:$0]  %s132_s5, 16, %s134_s30, [#allocation17]  }
  0x1f   :  { %2117 = dma.done.wait [#allocation5], 128  }
  0x20   :  { %2118 = vsyncadd [#allocation5], 4294967168 }
  0x21   :  { %2119 = dma.done.wait [#allocation8], 512  }
  0x22   :  { %2120 = vsyncadd [#allocation8], 4294966784 }
  0x23   :  { %2121 = dma.done.wait [#allocation11], 272  }
  0x24   :  { %2122 = vsyncadd [#allocation11], 4294967024 }
  0x25   :  { %2123 = dma.done.wait [#allocation14], 272  }
  0x26   :  { %2124 = vsyncadd [#allocation14], 4294967024 }
  0x27   :  { %2125 = dma.done.wait [#allocation17], 272  }
  0x28   :  { %2126 = vsyncadd [#allocation17], 4294967024  ;;  %v1667_v0 = vld [vmem:[#allocation7 + $0x8] sm:$0xff]  ;;  %v2264_v1 = vld [vmem:[#allocation9 + $0x8] sm:$0xff]  ;;  %vm230_vm0 = vcmask 261120   ;;  %s2144_s15 = smov 32  }
  0x29   :  { %v178_v2 = vld [vmem:[#allocation4] sm:$0x1]  ;;  %239 = vmatpush.bf16.msra.mxu0 %v1667_v0  ;;  %311 = vmatpush.bf16.msra.mxu1 %v2264_v1  ;;  %v1666_v3 = vld [vmem:[#allocation7] sm:$0xff]  ;;  %v2267_v4 = vld [vmem:[#allocation9] sm:$0xff]  ;;  %s1543_s22 = sshll.u32 %s2578_s12, 4  ;;  %s2147_s23 = smov 2   ;;  %s1544_s22 = int_to_ptr.hbm [resolvable:$true] %s1543_s22 }
  0x2a   :  { %v179_v5 = vld [vmem:[#allocation4 + $0x1] sm:$0x1]  ;;  %v180_v6 = vld [vmem:[#allocation4 + $0x2] sm:$0x1]  ;;  %v181_v7 = vld [vmem:[#allocation4 + $0x3] sm:$0x1] }
  0x2b   :  { %195 = vst [vmem:[#allocation1] ss:$9 sm:$0xff] %v178_v2  ;;  %v282_v8 = vld [vmem:[%s2575_s9] sm:$0x3]  ;;  %v182_v9 = vld [vmem:[#allocation4 + $0x4] sm:$0x1] }
  0x2c   :  { %198 = vst [vmem:[#allocation1 + $0x1] ss:$9 sm:$0xff] %v179_v5  ;;  %v289_v10 = vpack.c.bf16 %v282_v8, %v282_v8  ;;  %v183_v11 = vld [vmem:[#allocation4 + $0x5] sm:$0x1]  ;;  %v184_v12 = vld [vmem:[#allocation4 + $0x6] sm:$0x1] }
  0x2d   :  { %240 = vmatpush.bf16.msra.mxu0 %v1666_v3  ;;  %312 = vmatpush.bf16.msra.mxu1 %v2267_v4  ;;  %201 = vst [vmem:[#allocation1 + $0x2] ss:$9 sm:$0xff] %v180_v6  ;;  %v185_v13 = vld [vmem:[#allocation4 + $0x7] sm:$0x1]  ;;  %v1697_v16 = vld [vmem:[#allocation10] ss:$0 sm:$0xff] }
  0x2e   :  { %204 = vst [vmem:[#allocation1 + $0x3] ss:$9 sm:$0xff] %v181_v7  ;;  %v283_v31 = vld [vmem:[%s2576_s10] sm:$0x3]  ;;  %v2289_v53 = vld [vmem:[#allocation13 + $0x8] sm:$0xff]  ;;  %v2293_v54 = vld [vmem:[#allocation12] sm:$0xff] }
  0x2f   :  { %207 = vst [vmem:[#allocation1 + $0x4] ss:$9 sm:$0xff] %v182_v9  ;;  %v2287_v52 = vld [vmem:[#allocation12 + $0x8] sm:$0xff]  ;;  %417 = vmatpush.bf16.msra.mxu3 %v2289_v53  ;;  %v2295_v55 = vld [vmem:[#allocation13] sm:$0xff]  ;;  %v2322_v5 = vld [vmem:[#allocation15] ss:$0 sm:$0xff] }
  0x30   :  { %210 = vst [vmem:[#allocation1 + $0x5] ss:$9 sm:$0xff] %v183_v11  ;;  %1601 = vmatmul.msk.bf16.vlgmr.msra.gmra.mxu1 %vm230_vm0, %v289_v10  ;;  %388 = vmatpush.bf16.msra.mxu2 %v2287_v52  ;;  %v1591_v59 = vld [vmem:[%s2575_s9 + $0x2] sm:$0x3]  ;;  %s1556_s2 = sshll.u32 %s2579_s13, 4  ;;  %s2148_s25 = smov [#allocation22]   ;;  %s1557_s2 = int_to_ptr.hbm [resolvable:$true] %s1556_s2 }
  0x31   :  { %480 = vmatpush.bf16.msrb.mxu0 %v2264_v1  ;;  %213 = vst [vmem:[#allocation1 + $0x6] ss:$9 sm:$0xff] %v184_v12  ;;  %538 = vmatpush.bf16.msrb.mxu1 %v2287_v52  ;;  %v395_v60 = vpack.c.bf16 %v1591_v59, %v1591_v59  ;;  %v1592_v12 = vld [vmem:[%s2576_s10 + $0x2] sm:$0x3]  ;;  %s2145_s10 = smov 96   ;;  %s1554_s26 = sshll.u32 %s2148_s25, 4  ;;  %s1555_s26 = int_to_ptr.vmem [resolvable:$true] %s1554_s26 }
  0x32   :  { %216 = vst [vmem:[#allocation1 + $0x7] ss:$9 sm:$0xff] %v185_v13  ;;  %s2149_s12 = smov [#allocation19]   ;;  %s1530_s29 = sshll.u32 %s2577_s11, 4  ;;  %s1531_s29 = int_to_ptr.hbm [resolvable:$true] %s1530_s29 }
  0x33   :  { %418 = vmatpush.bf16.msra.mxu3 %v2295_v55  ;;  %s1528_s27 = sshll.u32 %s2149_s12, 4  ;;  %s2150_s13 = smov 128   ;;  %s1529_s27 = int_to_ptr.vmem [resolvable:$true] %s1528_s27 }
  0x34   :  { %389 = vmatpush.bf16.msra.mxu2 %v2293_v54  ;;  %s2151_s5 = smov 8  }
  0x35   :  { %481 = vmatpush.bf16.msrb.mxu0 %v2267_v4  ;;  %539 = vmatpush.bf16.msrb.mxu1 %v2293_v54 }
  0x36   :  { %1620 = vmatmul.msk.bf16.vlgmr.msra.gmra.mxu3 %vm230_vm0, %v395_v60 }
  0x37   :  { %617 = vmatpush.bf16.msrb.mxu3 %v2264_v1 }
  0x38   :  { %558 = vmatpush.bf16.msrb.mxu2 %v2289_v53 }
  0x39   :  { %v217_v14 = vld [vmem:[#allocation1] sm:$0xff]  ;;  %695 = vmatpush.bf16.msra.mxu1 %v2289_v53 }
  0x3a   :  { %1590 = vmatmul.msk.bf16.vlgmr.msra.gmra.mxu0 %vm230_vm0, %v217_v14 }
  0x3b   :  { %675 = vmatpush.bf16.msra.mxu0 %v2287_v52  ;;  %618 = vmatpush.bf16.msrb.mxu3 %v2267_v4 }
  0x3c   :  { %559 = vmatpush.bf16.msrb.mxu2 %v2295_v55 }
  0x3d   :  { %696 = vmatpush.bf16.msra.mxu1 %v2295_v55 }
  0x3f   :  { %676 = vmatpush.bf16.msra.mxu0 %v2293_v54  ;;  %812 = vmatpush.bf16.msra.mxu3 %v2287_v52 }
  0x43   :  { %813 = vmatpush.bf16.msra.mxu3 %v2293_v54 }
  0xad   :  { %v314_v15 = vpop.f32.mrf.mxu1 }
  0xb5   :  { %v316_v17 = vpop.f32.mrf.mxu1 }
  0xb7   :  { %v242_v18 = vpop.f32.mrf.mxu0 }
  0xb8   :  { %v243_v19 = vadd.f32 %v1697_v16, %v242_v18 }
  0xb9   :  { %v420_v62 = vpop.f32.mrf.mxu3 }
  0xba   :  { %v249_v20 = vrot.slane %v243_v19, 2  ;;  %v250_v21 = vrot.slane %v243_v19, 4  ;;  %v251_v22 = vrot.slane %v243_v19, 6  ;;  %261 = vst [vmem:[#allocation2] sm:$0x3] %v243_v19 }
  0xbc   :  { %262 = vst [vmem:[#allocation2 + $0x2] sm:$0x3] %v249_v20 }
  0xbd   :  { %263 = vst [vmem:[#allocation2 + $0x4] sm:$0x3] %v250_v21 }
  0xbe   :  { %264 = vst [vmem:[#allocation2 + $0x6] sm:$0x3] %v251_v22 }
  0xbf   :  { %v244_v23 = vpop.f32.mrf.mxu0 }
  0xc0   :  { %v245_v24 = vadd.f32 %v1697_v16, %v244_v23 }
  0xc1   :  { %v288_v25 = vld [vmem:[#allocation2] sm:$0x3]  ;;  %v422_v63 = vpop.f32.mrf.mxu3 }
  0xc2   :  { %v318_v26 = vadd.f32 %v314_v15, %v288_v25  ;;  %v252_v27 = vrot.slane %v245_v24, 2  ;;  %v253_v28 = vrot.slane %v245_v24, 4  ;;  %v254_v29 = vrot.slane %v245_v24, 6  ;;  %265 = vst [vmem:[#allocation2 + $0x8] sm:$0x3] %v245_v24 }
  0xc3   :  { %v473_v0 = vld [vmem:[#allocation2 + $0x2] sm:$0x3] }
  0xc4   :  { %266 = vst [vmem:[#allocation2 + $0xa] sm:$0x3] %v252_v27  ;;  %1700 = vtanh.f32 %v318_v26  ;;  %v1602_v32 = vmul.f32 -1.442695, %v318_v26 }
  0xc5   :  { %267 = vst [vmem:[#allocation2 + $0xc] sm:$0x3] %v253_v28 }
  0xc6   :  { %268 = vst [vmem:[#allocation2 + $0xe] sm:$0x3] %v254_v29  ;;  %1702 = vpow2.f32 %v1602_v32 }
  0xca   :  { %v1701_v30 = vpop.eup %1700 }
  0xcb   :  { %345 = vrot.lane.b32.xlu0 %v1701_v30, %s2132_s16 }
  0xcc   :  { %v1703_v33 = vpop.eup %1702 }
  0xcd   :  { %v322_v34 = vadd.f32 1.0, %v1703_v33 }
  0xcf   :  { %1704 = vrcp.f32 %v322_v34  ;;  %v334_v40 = vand.u32 2147483648, %v322_v34  ;;  %vm328_vm2 = vweird.f32 %v322_v34  ;;  %v332_v41 = vand.u32 2147483647, %v322_v34 }
  0xd1   :  { %v335_v43 = vor.u32 1.1754944e-38, %v334_v40  ;;  %vm333_vm4 = vcmp.eq.f32.partialorder %v332_v41, 8.507059e+37 }
  0xd3   :  { %340 = vrot.lane.b32.xlu0 %v283_v31, %s2144_s15 }
  0xd5   :  { %v1705_v35 = vpop.eup %1704 }
  0xd6   :  { %v324_v36 = vmul.f32 %v1705_v35, %v322_v34  ;;  %vm329_vm1 = vweird.f32 %v1705_v35 }
  0xd7   :  { %vm330_vm3 = vmor %vm328_vm2, %vm329_vm1 }
  0xd8   :  { %v325_v37 = vsub.f32 1.0, %v324_v36 }
  0xda   :  { %v326_v38 = vmul.f32 %v1705_v35, %v325_v37 }
  0xdc   :  { %v327_v39 = vadd.f32 %v1705_v35, %v326_v38 }
  0xde   :  { %v331_v42 = vsel %vm330_vm3, %v1705_v35, %v327_v39 }
  0xdf   :  { %v336_v45 = vsel %vm333_vm4, %v335_v43, %v331_v42 }
 0x13d   :  { %v346_v44 = vpop.permute.xlu0 %345 }
 0x13e   :  { %v348_v46 = vmul.f32 %v346_v44, %v336_v45 }
 0x140   :  { %350 = vrot.lane.b32.xlu1 %v348_v46, %s2144_s15 }
 0x145   :  { %v341_v47 = vpop.permute.xlu0 %340 }
 0x146   :  { %v343_v48 = vmul.f32 %v341_v47, %v336_v45 }
 0x1b2   :  { %v351_v49 = vpop.permute.xlu1 %350 }
 0x1b3   :  { %v2283_v50 = vadd.f32 %v351_v49, %v343_v48 }
 0x1b5   :  { %1706 = vtanh.f32 %v2283_v50 }
 0x1bb   :  { %v1707_v51 = vpop.eup %1706 }
 0x1bc   :  { %356 = vrot.lane.b32.xlu1 %v1707_v51, %s2132_s16 }
 0x22e   :  { %v357_v56 = vpop.permute.xlu1 %356 }
 0x22f   :  { %v359_v57 = vmul.f32 %v357_v56, %v336_v45 }
 0x231   :  { %v360_v58 = vpack.c.bf16 %v359_v57, %v359_v57 }
 0x233   :  { %365 = vrot.lane.b32.xlu2 %v360_v58, %s2144_s15 }
 0x28d   :  { %v366_v61 = vpop.permute.xlu2 %365 }
 0x28e   :  { %1611 = vmatmul.msk.bf16.vlgmr.msra.gmra.mxu2 %vm230_vm0, %v366_v61  ;;  %1622 = vmatmul.msk.bf16.vlgmr.msrb.gmra.mxu0 %vm230_vm0, %v366_v61 }
 0x28f   :  { %754 = vmatpush.bf16.msra.mxu2 %v2264_v1  ;;  %832 = vmatpush.bf16.msrb.mxu0 %v2289_v53 }
 0x293   :  { %755 = vmatpush.bf16.msra.mxu2 %v2267_v4  ;;  %833 = vmatpush.bf16.msrb.mxu0 %v2295_v55 }
 0x30b   :  { %v483_v2 = vpop.f32.mrf.mxu0 }
 0x30c   :  { %v487_v3 = vadd.f32 %v483_v2, %v473_v0 }
 0x30e   :  { %1708 = vtanh.f32 %v487_v3  ;;  %v1623_v14 = vmul.f32 -1.442695, %v487_v3  ;;  %v610_v3 = vld [vmem:[#allocation2 + $0x4] sm:$0x3] }
 0x311   :  { %v391_v6 = vpop.f32.mrf.mxu2 }
 0x312   :  { %v392_v7 = vadd.f32 %v2322_v5, %v391_v6 }
 0x313   :  { %v485_v8 = vpop.f32.mrf.mxu0 }
 0x314   :  { %v1709_v9 = vpop.eup %1708  ;;  %v424_v10 = vadd.f32 %v420_v62, %v392_v7 }
 0x315   :  { %510 = vrot.lane.b32.xlu2 %v1709_v9, %s2132_s16 }
 0x316   :  { %1710 = vtanh.f32 %v424_v10  ;;  %v1621_v20 = vmul.f32 -1.442695, %v424_v10 }
 0x317   :  { %1712 = vpow2.f32 %v1623_v14 }
 0x319   :  { %v393_v11 = vpop.f32.mrf.mxu2 }
 0x31c   :  { %v1711_v13 = vpop.eup %1710 }
 0x31d   :  { %451 = vrot.lane.b32.xlu0 %v1711_v13, %s2132_s16  ;;  %446 = vrot.lane.b32.xlu2 %v1592_v12, %s2144_s15  ;;  %v1713_v15 = vpop.eup %1712 }
 0x31e   :  { %v491_v16 = vadd.f32 1.0, %v1713_v15 }
 0x320   :  { %1714 = vrcp.f32 %v491_v16  ;;  %v503_v23 = vand.u32 2147483648, %v491_v16  ;;  %vm497_vm6 = vweird.f32 %v491_v16  ;;  %v501_v24 = vand.u32 2147483647, %v491_v16 }
 0x321   :  { %1716 = vpow2.f32 %v1621_v20 }
 0x322   :  { %v504_v27 = vor.u32 1.1754944e-38, %v503_v23  ;;  %vm502_vm8 = vcmp.eq.f32.partialorder %v501_v24, 8.507059e+37 }
 0x326   :  { %v1715_v17 = vpop.eup %1714 }
 0x327   :  { %v493_v18 = vmul.f32 %v1715_v17, %v491_v16  ;;  %vm498_vm5 = vweird.f32 %v1715_v17  ;;  %v1717_v25 = vpop.eup %1716 }
 0x328   :  { %vm499_vm7 = vmor %vm497_vm6, %vm498_vm5  ;;  %v428_v28 = vadd.f32 1.0, %v1717_v25 }
 0x329   :  { %v494_v19 = vsub.f32 1.0, %v493_v18 }
 0x32a   :  { %1718 = vrcp.f32 %v428_v28  ;;  %v440_v37 = vand.u32 2147483648, %v428_v28  ;;  %vm434_vm10 = vweird.f32 %v428_v28  ;;  %v438_v38 = vand.u32 2147483647, %v428_v28 }
 0x32b   :  { %v495_v21 = vmul.f32 %v1715_v17, %v494_v19 }
 0x32c   :  { %v441_v40 = vor.u32 1.1754944e-38, %v440_v37  ;;  %vm439_vm12 = vcmp.eq.f32.partialorder %v438_v38, 8.507059e+37 }
 0x32d   :  { %v496_v22 = vadd.f32 %v1715_v17, %v495_v21 }
 0x32f   :  { %v500_v26 = vsel %vm499_vm7, %v1715_v17, %v496_v22 }
 0x330   :  { %v505_v30 = vsel %vm502_vm8, %v504_v27, %v500_v26  ;;  %v1719_v32 = vpop.eup %1718 }
 0x331   :  { %v430_v33 = vmul.f32 %v1719_v32, %v428_v28  ;;  %vm435_vm9 = vweird.f32 %v1719_v32  ;;  %v508_v44 = vmul.f32 %v505_v30, %v2283_v50 }
 0x332   :  { %vm436_vm11 = vmor %vm434_vm10, %vm435_vm9 }
 0x333   :  { %v431_v34 = vsub.f32 1.0, %v430_v33 }
 0x335   :  { %v432_v35 = vmul.f32 %v1719_v32, %v431_v34 }
 0x337   :  { %v433_v36 = vadd.f32 %v1719_v32, %v432_v35 }
 0x339   :  { %v437_v39 = vsel %vm436_vm11, %v1719_v32, %v433_v36 }
 0x33a   :  { %v442_v41 = vsel %vm439_vm12, %v441_v40, %v437_v39 }
 0x36f   :  { %v511_v29 = vpop.permute.xlu2 %510 }
 0x370   :  { %v513_v31 = vmul.f32 %v511_v29, %v505_v30 }
 0x372   :  { %515 = vrot.lane.b32.xlu1 %v513_v31, %s2144_s15 }
 0x377   :  { %v447_v48 = vpop.permute.xlu2 %446 }
 0x378   :  { %v449_v49 = vmul.f32 %v447_v48, %v442_v41 }
 0x38f   :  { %v452_v42 = vpop.permute.xlu0 %451 }
 0x390   :  { %v454_v43 = vmul.f32 %v452_v42, %v442_v41 }
 0x392   :  { %456 = vrot.lane.b32.xlu0 %v454_v43, %s2144_s15 }
 0x3e4   :  { %v516_v45 = vpop.permute.xlu1 %515 }
 0x3e5   :  { %v2334_v46 = vadd.f32 %v516_v45, %v508_v44 }
 0x3e7   :  { %1720 = vtanh.f32 %v2334_v46 }
 0x3ed   :  { %v1721_v47 = vpop.eup %1720 }
 0x3ee   :  { %521 = vrot.lane.b32.xlu1 %v1721_v47, %s2132_s16 }
 0x404   :  { %v457_v51 = vpop.permute.xlu0 %456 }
 0x405   :  { %v2338_v56 = vadd.f32 %v457_v51, %v449_v49 }
 0x407   :  { %1722 = vtanh.f32 %v2338_v56 }
 0x40d   :  { %v1723_v57 = vpop.eup %1722 }
 0x40e   :  { %462 = vrot.lane.b32.xlu2 %v1723_v57, %s2132_s16 }
 0x460   :  { %v522_v58 = vpop.permute.xlu1 %521 }
 0x461   :  { %v524_v50 = vmul.f32 %v522_v58, %v505_v30 }
 0x463   :  { %v525_v59 = vpack.c.bf16 %v524_v50, %v524_v50 }
 0x465   :  { %527 = vrot.lane.b32.xlu0 %v525_v59, %s2144_s15 }
 0x468   :  { %v463_v60 = vpop.permute.xlu2 %462 }
 0x469   :  { %v2343_v61 = vmul.f32 %v463_v60, %v442_v41 }
 0x46b   :  { %v545_v62 = vpack.c.bf16 %v2343_v61, %v2343_v61 }
 0x46d   :  { %547 = vrot.lane.b32.xlu1 %v545_v62, %s2144_s15 }
 0x4d7   :  { %v528_v63 = vpop.permute.xlu0 %527 }
 0x4d8   :  { %1624 = vmatmul.msk.bf16.vlgmr.msrb.gmra.mxu1 %vm230_vm0, %v528_v63  ;;  %1627 = vmatmul.msk.bf16.vlgmr.msrb.gmra.mxu3 %vm230_vm0, %v528_v63 }
 0x4d9   :  { %891 = vmatpush.bf16.msrb.mxu1 %v2264_v1  ;;  %969 = vmatpush.bf16.msrb.mxu3 %v2289_v53 }
 0x4dd   :  { %892 = vmatpush.bf16.msrb.mxu1 %v2267_v4  ;;  %970 = vmatpush.bf16.msrb.mxu3 %v2295_v55 }
 0x4df   :  { %v548_v0 = vpop.permute.xlu1 %547 }
 0x4e0   :  { %1625 = vmatmul.msk.bf16.vlgmr.msrb.gmra.mxu2 %vm230_vm0, %v548_v0 }
 0x4e1   :  { %949 = vmatpush.bf16.msrb.mxu2 %v2287_v52 }
 0x4e5   :  { %950 = vmatpush.bf16.msrb.mxu2 %v2293_v54 }
 0x555   :  { %v541_v2 = vpop.f32.mrf.mxu1 }
 0x556   :  { %v542_v9 = vadd.f32 %v2322_v5, %v541_v2 }
 0x55b   :  { %v620_v6 = vpop.f32.mrf.mxu3 }
 0x55c   :  { %v624_v7 = vadd.f32 %v620_v6, %v610_v3 }
 0x55d   :  { %v543_v8 = vpop.f32.mrf.mxu1 }
 0x55e   :  { %1724 = vtanh.f32 %v624_v7  ;;  %v1628_v16 = vmul.f32 -1.442695, %v624_v7  ;;  %v747_v7 = vld [vmem:[#allocation2 + $0x6] sm:$0x3] }
 0x563   :  { %v561_v10 = vpop.f32.mrf.mxu2  ;;  %v622_v11 = vpop.f32.mrf.mxu3 }
 0x564   :  { %v1725_v12 = vpop.eup %1724  ;;  %v565_v13 = vadd.f32 %v561_v10, %v542_v9 }
 0x565   :  { %647 = vrot.lane.b32.xlu2 %v1725_v12, %s2132_s16 }
 0x566   :  { %1726 = vtanh.f32 %v565_v13  ;;  %v1626_v22 = vmul.f32 -1.442695, %v565_v13 }
 0x567   :  { %1728 = vpow2.f32 %v1628_v16 }
 0x56b   :  { %v563_v14 = vpop.f32.mrf.mxu2 }
 0x56c   :  { %v1727_v15 = vpop.eup %1726 }
 0x56d   :  { %588 = vrot.lane.b32.xlu0 %v1727_v15, %s2132_s16  ;;  %v1729_v17 = vpop.eup %1728 }
 0x56e   :  { %v628_v18 = vadd.f32 1.0, %v1729_v17 }
 0x570   :  { %1730 = vrcp.f32 %v628_v18  ;;  %v640_v25 = vand.u32 2147483648, %v628_v18  ;;  %vm634_vm14 = vweird.f32 %v628_v18  ;;  %v638_v26 = vand.u32 2147483647, %v628_v18 }
 0x571   :  { %1732 = vpow2.f32 %v1626_v22 }
 0x572   :  { %v641_v29 = vor.u32 1.1754944e-38, %v640_v25  ;;  %vm639_vm1 = vcmp.eq.f32.partialorder %v638_v26, 8.507059e+37 }
 0x576   :  { %v1731_v19 = vpop.eup %1730 }
 0x577   :  { %v630_v20 = vmul.f32 %v1731_v19, %v628_v18  ;;  %vm635_vm13 = vweird.f32 %v1731_v19  ;;  %v1733_v27 = vpop.eup %1732 }
 0x578   :  { %vm636_vm15 = vmor %vm634_vm14, %vm635_vm13  ;;  %v569_v30 = vadd.f32 1.0, %v1733_v27 }
 0x579   :  { %v631_v21 = vsub.f32 1.0, %v630_v20 }
 0x57a   :  { %1734 = vrcp.f32 %v569_v30  ;;  %v581_v39 = vand.u32 2147483648, %v569_v30  ;;  %vm575_vm3 = vweird.f32 %v569_v30  ;;  %v579_v40 = vand.u32 2147483647, %v569_v30 }
 0x57b   :  { %v632_v23 = vmul.f32 %v1731_v19, %v631_v21 }
 0x57c   :  { %v582_v42 = vor.u32 1.1754944e-38, %v581_v39  ;;  %vm580_vm5 = vcmp.eq.f32.partialorder %v579_v40, 8.507059e+37 }
 0x57d   :  { %v633_v24 = vadd.f32 %v1731_v19, %v632_v23 }
 0x57f   :  { %v637_v28 = vsel %vm636_vm15, %v1731_v19, %v633_v24 }
 0x580   :  { %v642_v32 = vsel %vm639_vm1, %v641_v29, %v637_v28  ;;  %v1735_v34 = vpop.eup %1734 }
 0x581   :  { %v571_v35 = vmul.f32 %v1735_v34, %v569_v30  ;;  %vm576_vm2 = vweird.f32 %v1735_v34  ;;  %v645_v47 = vmul.f32 %v642_v32, %v2334_v46 }
 0x582   :  { %vm577_vm4 = vmor %vm575_vm3, %vm576_vm2 }
 0x583   :  { %v572_v36 = vsub.f32 1.0, %v571_v35 }
 0x585   :  { %v573_v37 = vmul.f32 %v1735_v34, %v572_v36 }
 0x587   :  { %v574_v38 = vadd.f32 %v1735_v34, %v573_v37 }
 0x589   :  { %v578_v41 = vsel %vm577_vm4, %v1735_v34, %v574_v38 }
 0x58a   :  { %v583_v44 = vsel %vm580_vm5, %v582_v42, %v578_v41 }
 0x58b   :  { %v586_v51 = vmul.f32 %v583_v44, %v2338_v56 }
 0x5bf   :  { %v648_v31 = vpop.permute.xlu2 %647 }
 0x5c0   :  { %v650_v33 = vmul.f32 %v648_v31, %v642_v32 }
 0x5c2   :  { %652 = vrot.lane.b32.xlu1 %v650_v33, %s2144_s15 }
 0x5df   :  { %v589_v43 = vpop.permute.xlu0 %588 }
 0x5e0   :  { %v591_v45 = vmul.f32 %v589_v43, %v583_v44 }
 0x5e2   :  { %593 = vrot.lane.b32.xlu2 %v591_v45, %s2144_s15 }
 0x634   :  { %v653_v48 = vpop.permute.xlu1 %652 }
 0x635   :  { %v2363_v49 = vadd.f32 %v653_v48, %v645_v47 }
 0x637   :  { %1736 = vtanh.f32 %v2363_v49 }
 0x63c   :  { %v594_v57 = vpop.permute.xlu2 %593 }
 0x63d   :  { %v1737_v58 = vpop.eup %1736  ;;  %v2367_v50 = vadd.f32 %v594_v57, %v586_v51 }
 0x63e   :  { %658 = vrot.lane.b32.xlu0 %v1737_v58, %s2132_s16 }
 0x63f   :  { %1738 = vtanh.f32 %v2367_v50 }
 0x645   :  { %v1739_v59 = vpop.eup %1738 }
 0x646   :  { %599 = vrot.lane.b32.xlu1 %v1739_v59, %s2132_s16 }
 0x6b0   :  { %v659_v60 = vpop.permute.xlu0 %658 }
 0x6b1   :  { %v661_v46 = vmul.f32 %v659_v60, %v642_v32 }
 0x6b3   :  { %v662_v62 = vpack.c.bf16 %v661_v46, %v661_v46 }
 0x6b5   :  { %664 = vrot.lane.b32.xlu2 %v662_v62, %s2144_s15 }
 0x6b8   :  { %v600_v63 = vpop.permute.xlu1 %599 }
 0x6b9   :  { %v2373_v0 = vmul.f32 %v600_v63, %v583_v44 }
 0x6bb   :  { %v682_v56 = vpack.c.bf16 %v2373_v0, %v2373_v0 }
 0x6bd   :  { %684 = vrot.lane.b32.xlu0 %v682_v56, %s2144_s15 }
 0x70f   :  { %v665_v2 = vpop.permute.xlu2 %664 }
 0x710   :  { %1629 = vmatmul.msk.bf16.vlgmr.msra.gmra.mxu0 %vm230_vm0, %v665_v2  ;;  %1632 = vmatmul.msk.bf16.vlgmr.msra.gmra.mxu2 %vm230_vm0, %v665_v2 }
 0x711   :  { %1028 = vmatpush.bf16.msra.mxu0 %v2264_v1  ;;  %1106 = vmatpush.bf16.msra.mxu2 %v2289_v53 }
 0x715   :  { %1029 = vmatpush.bf16.msra.mxu0 %v2267_v4  ;;  %1107 = vmatpush.bf16.msra.mxu2 %v2295_v55 }
 0x72f   :  { %v685_v3 = vpop.permute.xlu0 %684 }
 0x730   :  { %1630 = vmatmul.msk.bf16.vlgmr.msra.gmra.mxu1 %vm230_vm0, %v685_v3 }
 0x731   :  { %1086 = vmatpush.bf16.msra.mxu1 %v2287_v52 }
 0x735   :  { %1087 = vmatpush.bf16.msra.mxu1 %v2293_v54 }
 0x78d   :  { %v678_v6 = vpop.f32.mrf.mxu0 }
 0x78e   :  { %v679_v13 = vadd.f32 %v2322_v5, %v678_v6 }
 0x793   :  { %v757_v8 = vpop.f32.mrf.mxu2 }
 0x794   :  { %v761_v9 = vadd.f32 %v757_v8, %v747_v7 }
 0x795   :  { %v680_v10 = vpop.f32.mrf.mxu0 }
 0x796   :  { %1740 = vtanh.f32 %v761_v9  ;;  %v1633_v18 = vmul.f32 -1.442695, %v761_v9  ;;  %v884_v9 = vld [vmem:[#allocation2 + $0x8] sm:$0x3] }
 0x79b   :  { %v759_v11 = vpop.f32.mrf.mxu2 }
 0x79c   :  { %v1741_v12 = vpop.eup %1740 }
 0x79d   :  { %784 = vrot.lane.b32.xlu1 %v1741_v12, %s2132_s16 }
 0x7ad   :  { %v698_v14 = vpop.f32.mrf.mxu1 }
 0x7ae   :  { %v702_v15 = vadd.f32 %v698_v14, %v679_v13 }
 0x7b0   :  { %1742 = vtanh.f32 %v702_v15  ;;  %v1631_v19 = vmul.f32 -1.442695, %v702_v15 }
 0x7b1   :  { %1744 = vpow2.f32 %v1633_v18 }
 0x7b2   :  { %1746 = vpow2.f32 %v1631_v19 }
 0x7b5   :  { %v700_v16 = vpop.f32.mrf.mxu1 }
 0x7b6   :  { %v1743_v17 = vpop.eup %1742 }
 0x7b7   :  { %725 = vrot.lane.b32.xlu2 %v1743_v17, %s2132_s16  ;;  %v1745_v20 = vpop.eup %1744 }
 0x7b8   :  { %v1747_v21 = vpop.eup %1746  ;;  %v765_v22 = vadd.f32 1.0, %v1745_v20 }
 0x7b9   :  { %v706_v23 = vadd.f32 1.0, %v1747_v21 }
 0x7ba   :  { %1748 = vrcp.f32 %v765_v22  ;;  %v777_v33 = vand.u32 2147483648, %v765_v22  ;;  %vm771_vm7 = vweird.f32 %v765_v22  ;;  %v775_v34 = vand.u32 2147483647, %v765_v22 }
 0x7bb   :  { %1750 = vrcp.f32 %v706_v23  ;;  %v718_v36 = vand.u32 2147483648, %v706_v23  ;;  %vm712_vm10 = vweird.f32 %v706_v23  ;;  %v716_v38 = vand.u32 2147483647, %v706_v23 }
 0x7bc   :  { %v778_v39 = vor.u32 1.1754944e-38, %v777_v33  ;;  %vm776_vm12 = vcmp.eq.f32.partialorder %v775_v34, 8.507059e+37 }
 0x7bd   :  { %v719_v43 = vor.u32 1.1754944e-38, %v718_v36  ;;  %vm717_vm13 = vcmp.eq.f32.partialorder %v716_v38, 8.507059e+37 }
 0x7c0   :  { %v1749_v24 = vpop.eup %1748 }
 0x7c1   :  { %v1751_v25 = vpop.eup %1750  ;;  %v767_v26 = vmul.f32 %v1749_v24, %v765_v22  ;;  %vm772_vm6 = vweird.f32 %v1749_v24 }
 0x7c2   :  { %v708_v27 = vmul.f32 %v1751_v25, %v706_v23  ;;  %vm713_vm8 = vweird.f32 %v1751_v25  ;;  %vm773_vm9 = vmor %vm771_vm7, %vm772_vm6 }
 0x7c3   :  { %v768_v28 = vsub.f32 1.0, %v767_v26  ;;  %vm714_vm11 = vmor %vm712_vm10, %vm713_vm8 }
 0x7c4   :  { %v709_v29 = vsub.f32 1.0, %v708_v27 }
 0x7c5   :  { %v769_v30 = vmul.f32 %v1749_v24, %v768_v28 }
 0x7c6   :  { %v710_v31 = vmul.f32 %v1751_v25, %v709_v29 }
 0x7c7   :  { %v770_v32 = vadd.f32 %v1749_v24, %v769_v30 }
 0x7c8   :  { %v711_v35 = vadd.f32 %v1751_v25, %v710_v31 }
 0x7c9   :  { %v774_v37 = vsel %vm773_vm9, %v1749_v24, %v770_v32 }
 0x7ca   :  { %v715_v40 = vsel %vm714_vm11, %v1751_v25, %v711_v35  ;;  %v779_v41 = vsel %vm776_vm12, %v778_v39, %v774_v37 }
 0x7cb   :  { %v720_v47 = vsel %vm717_vm13, %v719_v43, %v715_v40  ;;  %v782_v51 = vmul.f32 %v779_v41, %v2363_v49 }
 0x7cc   :  { %v723_v59 = vmul.f32 %v720_v47, %v2367_v50 }
 0x80f   :  { %v785_v42 = vpop.permute.xlu1 %784 }
 0x810   :  { %v787_v44 = vmul.f32 %v785_v42, %v779_v41 }
 0x811   :  { %v726_v45 = vpop.permute.xlu2 %725 }
 0x812   :  { %v728_v48 = vmul.f32 %v726_v45, %v720_v47  ;;  %789 = vrot.lane.b32.xlu0 %v787_v44, %s2144_s15 }
 0x814   :  { %730 = vrot.lane.b32.xlu1 %v728_v48, %s2144_s15 }
 0x884   :  { %v790_v57 = vpop.permute.xlu0 %789 }
 0x885   :  { %v2393_v58 = vadd.f32 %v790_v57, %v782_v51 }
 0x886   :  { %v731_v60 = vpop.permute.xlu1 %730 }
 0x887   :  { %1752 = vtanh.f32 %v2393_v58  ;;  %v2397_v46 = vadd.f32 %v731_v60, %v723_v59 }
 0x889   :  { %1754 = vtanh.f32 %v2397_v46 }
 0x88d   :  { %v1753_v62 = vpop.eup %1752 }
 0x88e   :  { %795 = vrot.lane.b32.xlu2 %v1753_v62, %s2132_s16 }
 0x88f   :  { %v1755_v63 = vpop.eup %1754 }
 0x890   :  { %736 = vrot.lane.b32.xlu0 %v1755_v63, %s2132_s16 }
 0x8e8   :  { %v796_v56 = vpop.permute.xlu2 %795 }
 0x8e9   :  { %v798_v49 = vmul.f32 %v796_v56, %v779_v41 }
 0x8eb   :  { %v799_v2 = vpack.c.bf16 %v798_v49, %v798_v49 }
 0x8ed   :  { %801 = vrot.lane.b32.xlu1 %v799_v2, %s2144_s15 }
 0x902   :  { %v737_v3 = vpop.permute.xlu0 %736 }
 0x903   :  { %v2403_v50 = vmul.f32 %v737_v3, %v720_v47 }
 0x905   :  { %v819_v6 = vpack.c.bf16 %v2403_v50, %v2403_v50 }
 0x907   :  { %821 = vrot.lane.b32.xlu2 %v819_v6, %s2144_s15 }
 0x95f   :  { %v802_v7 = vpop.permute.xlu1 %801 }
 0x960   :  { %1634 = vmatmul.msk.bf16.vlgmr.msra.gmra.mxu3 %vm230_vm0, %v802_v7  ;;  %1637 = vmatmul.msk.bf16.vlgmr.msrb.gmra.mxu1 %vm230_vm0, %v802_v7 }
 0x961   :  { %v822_v8 = vpop.permute.xlu2 %821  ;;  %1165 = vmatpush.bf16.msra.mxu3 %v2264_v1  ;;  %1243 = vmatpush.bf16.msrb.mxu1 %v2289_v53 }
 0x962   :  { %1635 = vmatmul.msk.bf16.vlgmr.msrb.gmra.mxu0 %vm230_vm0, %v822_v8 }
 0x963   :  { %1223 = vmatpush.bf16.msrb.mxu0 %v2287_v52 }
 0x965   :  { %1166 = vmatpush.bf16.msra.mxu3 %v2267_v4  ;;  %1244 = vmatpush.bf16.msrb.mxu1 %v2295_v55 }
 0x967   :  { %1224 = vmatpush.bf16.msrb.mxu0 %v2293_v54 }
 0x9dd   :  { %v894_v10 = vpop.f32.mrf.mxu1 }
 0x9de   :  { %v898_v11 = vadd.f32 %v894_v10, %v884_v9 }
 0x9df   :  { %v835_v12 = vpop.f32.mrf.mxu0 }
 0x9e0   :  { %1756 = vtanh.f32 %v898_v11  ;;  %v1638_v21 = vmul.f32 -1.442695, %v898_v11 }
 0x9e3   :  { %v815_v13 = vpop.f32.mrf.mxu3 }
 0x9e4   :  { %v816_v14 = vadd.f32 %v2322_v5, %v815_v13  ;;  %v1021_v13 = vld [vmem:[#allocation2 + $0xa] sm:$0x3] }
 0x9e5   :  { %v896_v15 = vpop.f32.mrf.mxu1 }
 0x9e6   :  { %v1757_v16 = vpop.eup %1756  ;;  %v839_v17 = vadd.f32 %v835_v12, %v816_v14 }
 0x9e7   :  { %v837_v18 = vpop.f32.mrf.mxu0  ;;  %921 = vrot.lane.b32.xlu0 %v1757_v16, %s2132_s16 }
 0x9e8   :  { %1758 = vtanh.f32 %v839_v17  ;;  %v1636_v22 = vmul.f32 -1.442695, %v839_v17 }
 0x9e9   :  { %1760 = vpow2.f32 %v1638_v21 }
 0x9ea   :  { %1762 = vpow2.f32 %v1636_v22 }
 0x9eb   :  { %v817_v19 = vpop.f32.mrf.mxu3 }
 0x9ee   :  { %v1759_v20 = vpop.eup %1758 }
 0x9ef   :  { %862 = vrot.lane.b32.xlu1 %v1759_v20, %s2132_s16  ;;  %v1761_v23 = vpop.eup %1760 }
 0x9f0   :  { %v902_v24 = vadd.f32 1.0, %v1761_v23  ;;  %v1763_v25 = vpop.eup %1762 }
 0x9f1   :  { %v843_v26 = vadd.f32 1.0, %v1763_v25 }
 0x9f2   :  { %1764 = vrcp.f32 %v902_v24  ;;  %v914_v35 = vand.u32 2147483648, %v902_v24  ;;  %vm908_vm15 = vweird.f32 %v902_v24  ;;  %v912_v36 = vand.u32 2147483647, %v902_v24 }
 0x9f3   :  { %1766 = vrcp.f32 %v843_v26  ;;  %v855_v44 = vand.u32 2147483648, %v843_v26  ;;  %vm849_vm4 = vweird.f32 %v843_v26  ;;  %v853_v45 = vand.u32 2147483647, %v843_v26 }
 0x9f4   :  { %v915_v39 = vor.u32 1.1754944e-38, %v914_v35  ;;  %vm913_vm2 = vcmp.eq.f32.partialorder %v912_v36, 8.507059e+37 }
 0x9f5   :  { %v856_v48 = vor.u32 1.1754944e-38, %v855_v44  ;;  %vm854_vm6 = vcmp.eq.f32.partialorder %v853_v45, 8.507059e+37 }
 0x9f8   :  { %v1765_v27 = vpop.eup %1764 }
 0x9f9   :  { %v904_v28 = vmul.f32 %v1765_v27, %v902_v24  ;;  %v1767_v30 = vpop.eup %1766  ;;  %vm909_vm14 = vweird.f32 %v1765_v27 }
 0x9fa   :  { %v845_v32 = vmul.f32 %v1767_v30, %v843_v26  ;;  %vm910_vm1 = vmor %vm908_vm15, %vm909_vm14  ;;  %vm850_vm3 = vweird.f32 %v1767_v30 }
 0x9fb   :  { %v905_v29 = vsub.f32 1.0, %v904_v28  ;;  %vm851_vm5 = vmor %vm849_vm4, %vm850_vm3 }
 0x9fc   :  { %v846_v34 = vsub.f32 1.0, %v845_v32 }
 0x9fd   :  { %v906_v31 = vmul.f32 %v1765_v27, %v905_v29 }
 0x9fe   :  { %v847_v38 = vmul.f32 %v1767_v30, %v846_v34 }
 0x9ff   :  { %v907_v33 = vadd.f32 %v1765_v27, %v906_v31 }
 0xa00   :  { %v848_v43 = vadd.f32 %v1767_v30, %v847_v38 }
 0xa01   :  { %v911_v37 = vsel %vm910_vm1, %v1765_v27, %v907_v33 }
 0xa02   :  { %v916_v41 = vsel %vm913_vm2, %v915_v39, %v911_v37  ;;  %v852_v47 = vsel %vm851_vm5, %v1767_v30, %v848_v43 }
 0xa03   :  { %v857_v57 = vsel %vm854_vm6, %v856_v48, %v852_v47  ;;  %v919_v60 = vmul.f32 %v916_v41, %v2393_v58 }
 0xa04   :  { %v860_v49 = vmul.f32 %v857_v57, %v2397_v46 }
 0xa59   :  { %v922_v40 = vpop.permute.xlu0 %921 }
 0xa5a   :  { %v924_v42 = vmul.f32 %v922_v40, %v916_v41 }
 0xa5c   :  { %926 = vrot.lane.b32.xlu2 %v924_v42, %s2144_s15 }
 0xa61   :  { %v863_v51 = vpop.permute.xlu1 %862 }
 0xa62   :  { %v865_v59 = vmul.f32 %v863_v51, %v857_v57 }
 0xa64   :  { %867 = vrot.lane.b32.xlu0 %v865_v59, %s2144_s15 }
 0xab6   :  { %v927_v62 = vpop.permute.xlu2 %926 }
 0xab7   :  { %v2423_v63 = vadd.f32 %v927_v62, %v919_v60 }
 0xab9   :  { %1768 = vtanh.f32 %v2423_v63 }
 0xabf   :  { %v1769_v56 = vpop.eup %1768 }
 0xac0   :  { %932 = vrot.lane.b32.xlu1 %v1769_v56, %s2132_s16 }
 0xad6   :  { %v868_v2 = vpop.permute.xlu0 %867 }
 0xad7   :  { %v2428_v3 = vadd.f32 %v868_v2, %v860_v49 }
 0xad9   :  { %1770 = vtanh.f32 %v2428_v3 }
 0xadf   :  { %v1771_v6 = vpop.eup %1770 }
 0xae0   :  { %873 = vrot.lane.b32.xlu2 %v1771_v6, %s2132_s16 }
 0xb32   :  { %v933_v7 = vpop.permute.xlu1 %932 }
 0xb33   :  { %v935_v58 = vmul.f32 %v933_v7, %v916_v41 }
 0xb35   :  { %v936_v8 = vpack.c.bf16 %v935_v58, %v935_v58 }
 0xb37   :  { %938 = vrot.lane.b32.xlu0 %v936_v8, %s2144_s15 }
 0xb3a   :  { %v874_v9 = vpop.permute.xlu2 %873 }
 0xb3b   :  { %v2433_v10 = vmul.f32 %v874_v9, %v857_v57 }
 0xb3d   :  { %v956_v11 = vpack.c.bf16 %v2433_v10, %v2433_v10 }
 0xb3f   :  { %958 = vrot.lane.b32.xlu1 %v956_v11, %s2144_s15 }
 0xba9   :  { %v939_v46 = vpop.permute.xlu0 %938 }
 0xbaa   :  { %1639 = vmatmul.msk.bf16.vlgmr.msrb.gmra.mxu2 %vm230_vm0, %v939_v46  ;;  %1642 = vmatmul.msk.bf16.vlgmr.msra.gmra.mxu0 %vm230_vm0, %v939_v46 }
 0xbab   :  { %1302 = vmatpush.bf16.msrb.mxu2 %v2264_v1  ;;  %1380 = vmatpush.bf16.msra.mxu0 %v2289_v53 }
 0xbaf   :  { %1303 = vmatpush.bf16.msrb.mxu2 %v2267_v4  ;;  %1381 = vmatpush.bf16.msra.mxu0 %v2295_v55 }
 0xbb1   :  { %v959_v12 = vpop.permute.xlu1 %958 }
 0xbb2   :  { %1640 = vmatmul.msk.bf16.vlgmr.msrb.gmra.mxu3 %vm230_vm0, %v959_v12 }
 0xbb3   :  { %1360 = vmatpush.bf16.msrb.mxu3 %v2287_v52 }
 0xbb7   :  { %1361 = vmatpush.bf16.msrb.mxu3 %v2293_v54 }
 0xc27   :  { %v1031_v14 = vpop.f32.mrf.mxu0 }
 0xc28   :  { %v1035_v15 = vadd.f32 %v1031_v14, %v1021_v13  ;;  %v1158_v13 = vld [vmem:[#allocation2 + $0xc] sm:$0x3] }
 0xc2a   :  { %1772 = vtanh.f32 %v1035_v15  ;;  %v1643_v52 = vmul.f32 -1.442695, %v1035_v15 }
 0xc2d   :  { %v952_v16 = vpop.f32.mrf.mxu2 }
 0xc2e   :  { %v953_v4 = vadd.f32 %v2322_v5, %v952_v16 }
 0xc2f   :  { %v1033_v17 = vpop.f32.mrf.mxu0 }
 0xc30   :  { %v1773_v1 = vpop.eup %1772 }
 0xc31   :  { %1058 = vrot.lane.b32.xlu2 %v1773_v1, %s2132_s16 }
 0xc35   :  { %v954_v53 = vpop.f32.mrf.mxu2  ;;  %v972_v55 = vpop.f32.mrf.mxu3 }
 0xc36   :  { %v976_v18 = vadd.f32 %v972_v55, %v953_v4 }
 0xc38   :  { %1774 = vtanh.f32 %v976_v18  ;;  %v1641_v26 = vmul.f32 -1.442695, %v976_v18 }
 0xc39   :  { %1776 = vpow2.f32 %v1643_v52 }
 0xc3d   :  { %v974_v19 = vpop.f32.mrf.mxu3 }
 0xc3e   :  { %v1775_v20 = vpop.eup %1774 }
 0xc3f   :  { %999 = vrot.lane.b32.xlu0 %v1775_v20, %s2132_s16  ;;  %v1777_v54 = vpop.eup %1776 }
 0xc40   :  { %v1039_v21 = vadd.f32 1.0, %v1777_v54 }
 0xc42   :  { %1778 = vrcp.f32 %v1039_v21  ;;  %v1051_v28 = vand.u32 2147483648, %v1039_v21  ;;  %vm1045_vm8 = vweird.f32 %v1039_v21  ;;  %v1049_v29 = vand.u32 2147483647, %v1039_v21 }
 0xc43   :  { %1780 = vpow2.f32 %v1641_v26 }
 0xc44   :  { %v1052_v31 = vor.u32 1.1754944e-38, %v1051_v28  ;;  %vm1050_vm10 = vcmp.eq.f32.partialorder %v1049_v29, 8.507059e+37 }
 0xc48   :  { %v1779_v22 = vpop.eup %1778 }
 0xc49   :  { %v1041_v23 = vmul.f32 %v1779_v22, %v1039_v21  ;;  %vm1046_vm7 = vweird.f32 %v1779_v22  ;;  %v1781_v35 = vpop.eup %1780 }
 0xc4a   :  { %vm1047_vm9 = vmor %vm1045_vm8, %vm1046_vm7  ;;  %v980_v36 = vadd.f32 1.0, %v1781_v35 }
 0xc4b   :  { %v1042_v24 = vsub.f32 1.0, %v1041_v23 }
 0xc4c   :  { %1782 = vrcp.f32 %v980_v36  ;;  %v992_v42 = vand.u32 2147483648, %v980_v36  ;;  %vm986_vm12 = vweird.f32 %v980_v36  ;;  %v990_v43 = vand.u32 2147483647, %v980_v36 }
 0xc4d   :  { %v1043_v25 = vmul.f32 %v1779_v22, %v1042_v24 }
 0xc4e   :  { %v993_v45 = vor.u32 1.1754944e-38, %v992_v42  ;;  %vm991_vm14 = vcmp.eq.f32.partialorder %v990_v43, 8.507059e+37 }
 0xc4f   :  { %v1044_v27 = vadd.f32 %v1779_v22, %v1043_v25 }
 0xc51   :  { %v1048_v30 = vsel %vm1047_vm9, %v1779_v22, %v1044_v27 }
 0xc52   :  { %v1053_v32 = vsel %vm1050_vm10, %v1052_v31, %v1048_v30  ;;  %v1783_v37 = vpop.eup %1782 }
 0xc53   :  { %v982_v38 = vmul.f32 %v1783_v37, %v980_v36  ;;  %vm987_vm11 = vweird.f32 %v1783_v37  ;;  %v1056_v57 = vmul.f32 %v1053_v32, %v2423_v63 }
 0xc54   :  { %vm988_vm13 = vmor %vm986_vm12, %vm987_vm11 }
 0xc55   :  { %v983_v39 = vsub.f32 1.0, %v982_v38 }
 0xc57   :  { %v984_v40 = vmul.f32 %v1783_v37, %v983_v39 }
 0xc59   :  { %v985_v41 = vadd.f32 %v1783_v37, %v984_v40 }
 0xc5b   :  { %v989_v44 = vsel %vm988_vm13, %v1783_v37, %v985_v41 }
 0xc5c   :  { %v994_v48 = vsel %vm991_vm14, %v993_v45, %v989_v44 }
 0xc5d   :  { %v997_v56 = vmul.f32 %v994_v48, %v2428_v3 }
 0xc8b   :  { %v1059_v33 = vpop.permute.xlu2 %1058 }
 0xc8c   :  { %v1061_v34 = vmul.f32 %v1059_v33, %v1053_v32 }
 0xc8e   :  { %1063 = vrot.lane.b32.xlu1 %v1061_v34, %s2144_s15 }
 0xcb1   :  { %v1000_v47 = vpop.permute.xlu0 %999 }
 0xcb2   :  { %v1002_v51 = vmul.f32 %v1000_v47, %v994_v48 }
 0xcb4   :  { %1004 = vrot.lane.b32.xlu2 %v1002_v51, %s2144_s15 }
 0xd00   :  { %v1064_v59 = vpop.permute.xlu1 %1063 }
 0xd01   :  { %v2453_v60 = vadd.f32 %v1064_v59, %v1056_v57 }
 0xd03   :  { %1784 = vtanh.f32 %v2453_v60 }
 0xd09   :  { %v1785_v62 = vpop.eup %1784 }
 0xd0a   :  { %1069 = vrot.lane.b32.xlu0 %v1785_v62, %s2132_s16 }
 0xd0e   :  { %v1005_v49 = vpop.permute.xlu2 %1004 }
 0xd0f   :  { %v2458_v2 = vadd.f32 %v1005_v49, %v997_v56 }
 0xd11   :  { %1786 = vtanh.f32 %v2458_v2 }
 0xd17   :  { %v1787_v6 = vpop.eup %1786 }
 0xd18   :  { %1010 = vrot.lane.b32.xlu1 %v1787_v6, %s2132_s16 }
 0xd7c   :  { %v1070_v7 = vpop.permute.xlu0 %1069 }
 0xd7d   :  { %v1072_v63 = vmul.f32 %v1070_v7, %v1053_v32 }
 0xd7f   :  { %v1073_v58 = vpack.c.bf16 %v1072_v63, %v1072_v63 }
 0xd81   :  { %1075 = vrot.lane.b32.xlu2 %v1073_v58, %s2144_s15 }
 0xd8a   :  { %v1011_v8 = vpop.permute.xlu1 %1010 }
 0xd8b   :  { %v2463_v9 = vmul.f32 %v1011_v8, %v994_v48 }
 0xd8d   :  { %v1093_v11 = vpack.c.bf16 %v2463_v9, %v2463_v9 }
 0xd8f   :  { %1095 = vrot.lane.b32.xlu0 %v1093_v11, %s2144_s15 }
 0xddb   :  { %v1076_v3 = vpop.permute.xlu2 %1075 }
 0xddc   :  { %1644 = vmatmul.msk.bf16.vlgmr.msra.gmra.mxu1 %vm230_vm0, %v1076_v3  ;;  %1647 = vmatmul.msk.bf16.vlgmr.msra.gmra.mxu3 %vm230_vm0, %v1076_v3 }
 0xe01   :  { %v1096_v46 = vpop.permute.xlu0 %1095 }
 0xe02   :  { %1645 = vmatmul.msk.bf16.vlgmr.msra.gmra.mxu2 %vm230_vm0, %v1096_v46 }
 0xe59   :  { %v1089_v12 = vpop.f32.mrf.mxu1 }
 0xe5a   :  { %v1090_v4 = vadd.f32 %v2322_v5, %v1089_v12  ;;  %v1295_v12 = vld [vmem:[#allocation2 + $0xe] sm:$0x3] }
 0xe5f   :  { %v1168_v14 = vpop.f32.mrf.mxu3 }
 0xe60   :  { %v1172_v15 = vadd.f32 %v1168_v14, %v1158_v13 }
 0xe61   :  { %v1091_v16 = vpop.f32.mrf.mxu1 }
 0xe62   :  { %1788 = vtanh.f32 %v1172_v15  ;;  %v1648_v20 = vmul.f32 -1.442695, %v1172_v15  ;;  %v2495_v16 = vld [vmem:[#allocation15] ss:$0 sm:$0xff] }
 0xe67   :  { %v1170_v17 = vpop.f32.mrf.mxu3 }
 0xe68   :  { %v1789_v1 = vpop.eup %1788 }
 0xe69   :  { %1195 = vrot.lane.b32.xlu1 %v1789_v1, %s2132_s16 }
 0xe85   :  { %v1109_v53 = vpop.f32.mrf.mxu2 }
 0xe86   :  { %v1113_v55 = vadd.f32 %v1109_v53, %v1090_v4 }
 0xe88   :  { %1790 = vtanh.f32 %v1113_v55  ;;  %v1646_v21 = vmul.f32 -1.442695, %v1113_v55 }
 0xe89   :  { %1792 = vpow2.f32 %v1648_v20 }
 0xe8d   :  { %v1111_v18 = vpop.f32.mrf.mxu2 }
 0xe8e   :  { %v1791_v19 = vpop.eup %1790 }
 0xe8f   :  { %1136 = vrot.lane.b32.xlu2 %v1791_v19, %s2132_s16  ;;  %v1793_v52 = vpop.eup %1792 }
 0xe90   :  { %v1176_v54 = vadd.f32 1.0, %v1793_v52 }
 0xe92   :  { %1794 = vrcp.f32 %v1176_v54  ;;  %v1188_v29 = vand.u32 2147483648, %v1176_v54  ;;  %vm1182_vm1 = vweird.f32 %v1176_v54  ;;  %v1186_v30 = vand.u32 2147483647, %v1176_v54 }
 0xe93   :  { %1796 = vpow2.f32 %v1646_v21 }
 0xe94   :  { %v1189_v33 = vor.u32 1.1754944e-38, %v1188_v29  ;;  %vm1187_vm3 = vcmp.eq.f32.partialorder %v1186_v30, 8.507059e+37 }
 0xe98   :  { %v1795_v22 = vpop.eup %1794 }
 0xe99   :  { %v1797_v23 = vpop.eup %1796  ;;  %v1178_v24 = vmul.f32 %v1795_v22, %v1176_v54  ;;  %vm1183_vm15 = vweird.f32 %v1795_v22 }
 0xe9a   :  { %v1117_v25 = vadd.f32 1.0, %v1797_v23  ;;  %vm1184_vm2 = vmor %vm1182_vm1, %vm1183_vm15 }
 0xe9b   :  { %v1179_v26 = vsub.f32 1.0, %v1178_v24 }
 0xe9c   :  { %1798 = vrcp.f32 %v1117_v25  ;;  %v1129_v40 = vand.u32 2147483648, %v1117_v25  ;;  %vm1123_vm5 = vweird.f32 %v1117_v25  ;;  %v1127_v41 = vand.u32 2147483647, %v1117_v25 }
 0xe9d   :  { %v1180_v5 = vmul.f32 %v1795_v22, %v1179_v26 }
 0xe9e   :  { %v1130_v43 = vor.u32 1.1754944e-38, %v1129_v40  ;;  %vm1128_vm7 = vcmp.eq.f32.partialorder %v1127_v41, 8.507059e+37 }
 0xe9f   :  { %v1181_v28 = vadd.f32 %v1795_v22, %v1180_v5 }
 0xea1   :  { %v1185_v32 = vsel %vm1184_vm2, %v1795_v22, %v1181_v28 }
 0xea2   :  { %v1799_v27 = vpop.eup %1798  ;;  %v1190_v36 = vsel %vm1187_vm3, %v1189_v33, %v1185_v32 }
 0xea3   :  { %v1119_v31 = vmul.f32 %v1799_v27, %v1117_v25  ;;  %vm1124_vm4 = vweird.f32 %v1799_v27  ;;  %v1193_v48 = vmul.f32 %v1190_v36, %v2453_v60 }
 0xea4   :  { %vm1125_vm6 = vmor %vm1123_vm5, %vm1124_vm4  ;;  %vm470_vm5 = vcmask 254976  }
 0xea5   :  { %v1120_v34 = vsub.f32 1.0, %v1119_v31 }
 0xea7   :  { %v1121_v38 = vmul.f32 %v1799_v27, %v1120_v34 }
 0xea9   :  { %v1122_v39 = vadd.f32 %v1799_v27, %v1121_v38 }
 0xeab   :  { %v1126_v42 = vsel %vm1125_vm6, %v1799_v27, %v1122_v39 }
 0xeac   :  { %v1131_v45 = vsel %vm1128_vm7, %v1130_v43, %v1126_v42 }
 0xead   :  { %v1134_v62 = vmul.f32 %v1131_v45, %v2458_v2 }
 0xedb   :  { %v1196_v35 = vpop.permute.xlu1 %1195 }
 0xedc   :  { %v1198_v37 = vmul.f32 %v1196_v35, %v1190_v36 }
 0xede   :  { %1200 = vrot.lane.b32.xlu0 %v1198_v37, %s2144_s15 }
 0xee9   :  { %v1137_v44 = vpop.permute.xlu2 %1136 }
 0xeea   :  { %v1139_v47 = vmul.f32 %v1137_v44, %v1131_v45 }
 0xeec   :  { %1141 = vrot.lane.b32.xlu1 %v1139_v47, %s2144_s15 }
 0xf50   :  { %v1201_v51 = vpop.permute.xlu0 %1200 }
 0xf51   :  { %v2477_v57 = vadd.f32 %v1201_v51, %v1193_v48 }
 0xf53   :  { %1800 = vtanh.f32 %v2477_v57 }
 0xf59   :  { %v1801_v59 = vpop.eup %1800 }
 0xf5a   :  { %1206 = vrot.lane.b32.xlu2 %v1801_v59, %s2132_s16 }
 0xf5e   :  { %v1142_v56 = vpop.permute.xlu1 %1141 }
 0xf5f   :  { %v2482_v49 = vadd.f32 %v1142_v56, %v1134_v62 }
 0xf61   :  { %1802 = vtanh.f32 %v2482_v49 }
 0xf67   :  { %v1803_v6 = vpop.eup %1802 }
 0xf68   :  { %1147 = vrot.lane.b32.xlu0 %v1803_v6, %s2132_s16 }
 0xfb4   :  { %v1207_v7 = vpop.permute.xlu2 %1206 }
 0xfb5   :  { %v1209_v60 = vmul.f32 %v1207_v7, %v1190_v36 }
 0xfb7   :  { %v1210_v63 = vpack.c.bf16 %v1209_v60, %v1209_v60 }
 0xfb9   :  { %1212 = vrot.lane.b32.xlu1 %v1210_v63, %s2144_s15 }
 0xfda   :  { %v1148_v58 = vpop.permute.xlu0 %1147 }
 0xfdb   :  { %v2487_v8 = vmul.f32 %v1148_v58, %v1131_v45 }
 0xfdd   :  { %v1230_v11 = vpack.c.bf16 %v2487_v8, %v2487_v8 }
 0xfdf   :  { %1232 = vrot.lane.b32.xlu2 %v1230_v11, %s2144_s15 }
0x102b   :  { %v1213_v2 = vpop.permute.xlu1 %1212 }
0x102c   :  { %1649 = vmatmul.msk.bf16.vlgmr.msrb.gmra.mxu0 %vm230_vm0, %v1213_v2  ;;  %1652 = vmatmul.msk.bf16.vlgmr.msrb.gmra.mxu2 %vm230_vm0, %v1213_v2 }
0x1039   :  { %v1233_v3 = vpop.permute.xlu2 %1232 }
0x103a   :  { %1650 = vmatmul.msk.bf16.vlgmr.msrb.gmra.mxu1 %vm230_vm0, %v1233_v3 }
0x10a9   :  { %v1226_v46 = vpop.f32.mrf.mxu0 }
0x10aa   :  { %v1227_v17 = vadd.f32 %v2495_v16, %v1226_v46 }
0x10af   :  { %v1305_v13 = vpop.f32.mrf.mxu2 }
0x10b0   :  { %v1309_v14 = vadd.f32 %v1305_v13, %v1295_v12 }
0x10b1   :  { %v1228_v15 = vpop.f32.mrf.mxu0 }
0x10b2   :  { %1804 = vtanh.f32 %v1309_v14  ;;  %v1653_v20 = vmul.f32 -1.442695, %v1309_v14 }
0x10b7   :  { %v1246_v1 = vpop.f32.mrf.mxu1  ;;  %v1307_v4 = vpop.f32.mrf.mxu2 }
0x10b8   :  { %v1805_v53 = vpop.eup %1804  ;;  %v1250_v55 = vadd.f32 %v1246_v1, %v1227_v17 }
0x10b9   :  { %1332 = vrot.lane.b32.xlu0 %v1805_v53, %s2132_s16 }
0x10ba   :  { %1806 = vtanh.f32 %v1250_v55  ;;  %v1651_v52 = vmul.f32 -1.442695, %v1250_v55 }
0x10bb   :  { %1808 = vpow2.f32 %v1653_v20 }
0x10bc   :  { %1810 = vpow2.f32 %v1651_v52 }
0x10bf   :  { %v1248_v18 = vpop.f32.mrf.mxu1 }
0x10c0   :  { %v1807_v19 = vpop.eup %1806 }
0x10c1   :  { %1273 = vrot.lane.b32.xlu1 %v1807_v19, %s2132_s16  ;;  %v1809_v54 = vpop.eup %1808 }
0x10c2   :  { %v1313_v21 = vadd.f32 1.0, %v1809_v54  ;;  %v1811_v22 = vpop.eup %1810 }
0x10c3   :  { %v1254_v23 = vadd.f32 1.0, %v1811_v22 }
0x10c4   :  { %1812 = vrcp.f32 %v1313_v21  ;;  %v1325_v31 = vand.u32 2147483648, %v1313_v21  ;;  %vm1319_vm9 = vweird.f32 %v1313_v21  ;;  %v1323_v32 = vand.u32 2147483647, %v1313_v21 }
0x10c5   :  { %1814 = vrcp.f32 %v1254_v23  ;;  %v1266_v40 = vand.u32 2147483648, %v1254_v23  ;;  %vm1260_vm13 = vweird.f32 %v1254_v23  ;;  %v1264_v41 = vand.u32 2147483647, %v1254_v23 }
0x10c6   :  { %v1326_v35 = vor.u32 1.1754944e-38, %v1325_v31  ;;  %vm1324_vm11 = vcmp.eq.f32.partialorder %v1323_v32, 8.507059e+37 }
0x10c7   :  { %v1267_v43 = vor.u32 1.1754944e-38, %v1266_v40  ;;  %vm1265_vm15 = vcmp.eq.f32.partialorder %v1264_v41, 8.507059e+37 }
0x10ca   :  { %v1813_v24 = vpop.eup %1812 }
0x10cb   :  { %v1315_v25 = vmul.f32 %v1813_v24, %v1313_v21  ;;  %v1815_v5 = vpop.eup %1814  ;;  %vm1320_vm8 = vweird.f32 %v1813_v24 }
0x10cc   :  { %v1256_v28 = vmul.f32 %v1815_v5, %v1254_v23  ;;  %vm1321_vm10 = vmor %vm1319_vm9, %vm1320_vm8  ;;  %vm1261_vm12 = vweird.f32 %v1815_v5 }
0x10cd   :  { %v1316_v26 = vsub.f32 1.0, %v1315_v25  ;;  %vm1262_vm14 = vmor %vm1260_vm13, %vm1261_vm12 }
0x10ce   :  { %v1257_v30 = vsub.f32 1.0, %v1256_v28 }
0x10cf   :  { %v1317_v27 = vmul.f32 %v1813_v24, %v1316_v26 }
0x10d0   :  { %v1258_v34 = vmul.f32 %v1815_v5, %v1257_v30 }
0x10d1   :  { %v1318_v29 = vadd.f32 %v1813_v24, %v1317_v27 }
0x10d2   :  { %v1259_v39 = vadd.f32 %v1815_v5, %v1258_v34 }
0x10d3   :  { %v1322_v33 = vsel %vm1321_vm10, %v1813_v24, %v1318_v29 }
0x10d4   :  { %v1327_v36 = vsel %vm1324_vm11, %v1326_v35, %v1322_v33  ;;  %v1263_v42 = vsel %vm1262_vm14, %v1815_v5, %v1259_v39 }
0x10d5   :  { %v1268_v45 = vsel %vm1265_vm15, %v1267_v43, %v1263_v42  ;;  %v1330_v48 = vmul.f32 %v1327_v36, %v2477_v57 }
0x10d6   :  { %v1271_v56 = vmul.f32 %v1268_v45, %v2482_v49 }
0x112b   :  { %v1333_v37 = vpop.permute.xlu0 %1332 }
0x112c   :  { %v1335_v38 = vmul.f32 %v1333_v37, %v1327_v36 }
0x112e   :  { %1337 = vrot.lane.b32.xlu2 %v1335_v38, %s2144_s15 }
0x1133   :  { %v1274_v44 = vpop.permute.xlu1 %1273 }
0x1134   :  { %v1276_v47 = vmul.f32 %v1274_v44, %v1268_v45  ;;  %v1674_v44 = vld [vmem:[#allocation16] sm:$0xff] }
0x1136   :  { %1278 = vrot.lane.b32.xlu0 %v1276_v47, %s2144_s15 }
0x1188   :  { %v1338_v51 = vpop.permute.xlu2 %1337 }
0x1189   :  { %v1340_v59 = vadd.f32 %v1338_v51, %v1330_v48 }
0x118b   :  { %1816 = vtanh.f32 %v1340_v59 }
0x1191   :  { %v1817_v62 = vpop.eup %1816 }
0x1192   :  { %1343 = vrot.lane.b32.xlu1 %v1817_v62, %s2132_s16 }
0x11a8   :  { %v1279_v6 = vpop.permute.xlu0 %1278 }
0x11a9   :  { %v2505_v7 = vadd.f32 %v1279_v6, %v1271_v56  ;;  %v1699_v56 = vld [vmem:[#allocation18] ss:$0 sm:$0xff] }
0x11ab   :  { %1818 = vtanh.f32 %v2505_v7 }
0x11b1   :  { %v1819_v60 = vpop.eup %1818 }
0x11b2   :  { %1284 = vrot.lane.b32.xlu2 %v1819_v60, %s2132_s16 }
0x1204   :  { %v1344_v63 = vpop.permute.xlu1 %1343 }
0x1205   :  { %v2509_v58 = vmul.f32 %v1344_v63, %v1327_v36 }
0x1207   :  { %v1347_v57 = vpack.c.bf16 %v2509_v58, %v2509_v58 }
0x1209   :  { %1349 = vrot.lane.b32.xlu0 %v1347_v57, %s2144_s15 }
0x120c   :  { %v1285_v11 = vpop.permute.xlu2 %1284 }
0x120d   :  { %v1287_v2 = vmul.f32 %v1285_v11, %v1268_v45 }
0x120f   :  { %v1367_v3 = vpack.c.bf16 %v1287_v2, %v1287_v2 }
0x1211   :  { %1369 = vrot.lane.b32.xlu1 %v1367_v3, %s2144_s15 }
0x127b   :  { %v1350_v49 = vpop.permute.xlu0 %1349 }
0x127c   :  { %1654 = vmatmul.msk.bf16.vlgmr.msrb.gmra.mxu3 %vm230_vm0, %v1350_v49 }
0x1283   :  { %v1370_v46 = vpop.permute.xlu1 %1369 }
0x1284   :  { %1655 = vmatmul.msk.bf16.vlgmr.msra.gmra.mxu0 %vm230_vm0, %v1370_v46 }
0x12ff   :  { %v1363_v12 = vpop.f32.mrf.mxu3 }
0x1300   :  { %v1364_v13 = vadd.f32 %v2495_v16, %v1363_v12 }
0x1301   :  { %v1383_v14 = vpop.f32.mrf.mxu0 }
0x1302   :  { %v1387_v15 = vadd.f32 %v1383_v14, %v1364_v13 }
0x1304   :  { %1820 = vtanh.f32 %v1387_v15  ;;  %v1656_v16 = vmul.f32 -1.442695, %v1387_v15 }
0x1306   :  { %1822 = vpow2.f32 %v1656_v16 }
0x1307   :  { %v1365_v17 = vpop.f32.mrf.mxu3 }
0x1309   :  { %v1385_v1 = vpop.f32.mrf.mxu0 }
0x130a   :  { %v1821_v4 = vpop.eup %1820 }
0x130b   :  { %1410 = vrot.lane.b32.xlu2 %v1821_v4, %s2132_s16 }
0x130c   :  { %v1823_v53 = vpop.eup %1822 }
0x130d   :  { %v1391_v55 = vadd.f32 1.0, %v1823_v53 }
0x130f   :  { %1824 = vrcp.f32 %v1391_v55  ;;  %vm1397_vm2 = vweird.f32 %v1391_v55  ;;  %v1401_v21 = vand.u32 2147483647, %v1391_v55 }
0x1311   :  { %vm1402_vm4 = vcmp.eq.f32.partialorder %v1401_v21, 8.507059e+37 }
0x1313   :  { %467 = vrot.lane.b32.xlu2 %v2343_v61, %s2144_s15  ;;  %v1403_v61 = vand.u32 2147483648, %v1391_v55 }
0x1315   :  { %v1825_v18 = vpop.eup %1824  ;;  %v1404_v22 = vor.u32 1.1754944e-38, %v1403_v61 }
0x1316   :  { %v1393_v19 = vmul.f32 %v1825_v18, %v1391_v55  ;;  %vm1398_vm1 = vweird.f32 %v1825_v18 }
0x1317   :  { %vm1399_vm3 = vmor %vm1397_vm2, %vm1398_vm1 }
0x1318   :  { %v1394_v20 = vsub.f32 1.0, %v1393_v19 }
0x131a   :  { %v1395_v52 = vmul.f32 %v1825_v18, %v1394_v20 }
0x131b   :  { %878 = vrot.lane.b32.xlu2 %v2433_v10, %s2144_s15 }
0x131c   :  { %v1396_v54 = vadd.f32 %v1825_v18, %v1395_v52 }
0x131e   :  { %v1400_v10 = vsel %vm1399_vm3, %v1825_v18, %v1396_v54 }
0x131f   :  { %v1405_v24 = vsel %vm1402_vm4, %v1404_v22, %v1400_v10 }
0x1323   :  { %1289 = vrot.lane.b32.xlu2 %v1287_v2, %s2144_s15 }
0x132b   :  { %1437 = vrot.lane.b32.xlu2 %v1340_v59, %s2145_s10 }
0x1365   :  { %v1411_v23 = vpop.permute.xlu2 %1410 }
0x1366   :  { %v1413_v25 = vmul.f32 %v1411_v23, %v1405_v24 }
0x1368   :  { %1415 = vrot.lane.b32.xlu0 %v1413_v25, %s2144_s15 }
0x136d   :  { %v468_v26 = vpop.permute.xlu2 %467 }
0x136e   :  { %471 = vst.msk [vmem:[#allocation3] sm:$0x3] %vm470_vm5, %v468_v26 }
0x1370   :  { %604 = vrot.lane.b32.xlu0 %v2373_v0, %s2144_s15  ;;  %v1408_v0 = vmul.f32 %v1405_v24, %v2505_v7 }
0x1375   :  { %v1449_v5 = vld [vmem:[#allocation3] sm:$0x3]  ;;  %v879_v27 = vpop.permute.xlu2 %878 }
0x1376   :  { %1465 = vst [vmem:[#allocation1] ss:$4 sm:$0xff] %v1449_v5 }
0x1377   :  { %882 = vst.msk [vmem:[#allocation3 + $0x6] sm:$0x3] %vm470_vm5, %v879_v27 }
0x1378   :  { %1015 = vrot.lane.b32.xlu0 %v2463_v9, %s2144_s15 }
0x137d   :  { %v1290_v28 = vpop.permute.xlu2 %1289 }
0x137e   :  { %v1452_v29 = vld [vmem:[#allocation3 + $0x6] sm:$0x3]  ;;  %1293 = vst.msk [vmem:[#allocation3 + $0xc] sm:$0x3] %vm470_vm5, %v1290_v28 }
0x137f   :  { %1471 = vst [vmem:[#allocation1 + $0x3] ss:$4 sm:$0xff] %v1452_v29 }
0x1385   :  { %v1455_v30 = vld [vmem:[#allocation3 + $0xc] sm:$0x3]  ;;  %v1438_v31 = vpop.permute.xlu2 %1437 }
0x1386   :  { %1477 = vst [vmem:[#allocation1 + $0x22] ss:$4 sm:$0xff] %v1455_v30 }
0x1387   :  { %1440 = vst.msk [vmem:[#allocation22] sm:$0x3] %vm470_vm5, %v1438_v31 }
0x13da   :  { %v1416_v32 = vpop.permute.xlu0 %1415 }
0x13db   :  { %v1418_v33 = vadd.f32 %v1416_v32, %v1408_v0 }
0x13dd   :  { %1826 = vtanh.f32 %v1418_v33 }
0x13e2   :  { %v605_v34 = vpop.permute.xlu0 %604 }
0x13e3   :  { %v1827_v35 = vpop.eup %1826  ;;  %608 = vst.msk [vmem:[#allocation3 + $0x2] sm:$0x3] %vm470_vm5, %v605_v34 }
0x13e4   :  { %1421 = vrot.lane.b32.xlu1 %v1827_v35, %s2132_s16  ;;  %s2146_s16 = smov [#allocation20]  }
0x13e5   :  { %s1541_s1 = sshll.u32 %s2146_s16, 4  ;;  %s1542_s1 = int_to_ptr.vmem [resolvable:$true] %s1541_s1 }
0x13ea   :  { %v1450_v9 = vld [vmem:[#allocation3 + $0x2] sm:$0x3]  ;;  %v1016_v36 = vpop.permute.xlu0 %1015 }
0x13eb   :  { %1467 = vst [vmem:[#allocation1 + $0x1] ss:$4 sm:$0xff] %v1450_v9 }
0x13ec   :  { %1019 = vst.msk [vmem:[#allocation3 + $0x8] sm:$0x3] %vm470_vm5, %v1016_v36  ;;  %741 = vrot.lane.b32.xlu1 %v2403_v50, %s2144_s15 }
0x13f3   :  { %v1453_v37 = vld [vmem:[#allocation3 + $0x8] sm:$0x3] }
0x13f4   :  { %1473 = vst [vmem:[#allocation1 + $0x20] ss:$4 sm:$0xff] %v1453_v37  ;;  %1152 = vrot.lane.b32.xlu1 %v2487_v8, %s2144_s15  ;;  %v1675_v8 = vld [vmem:[#allocation16 + $0x8] sm:$0xff] }
0x13f5   :  { %1514 = vmatpush.bf16.msra.mxu1 %v1675_v8 }
0x13f9   :  { %1515 = vmatpush.bf16.msra.mxu1 %v1674_v44 }
0x13fc   :  { %1432 = vrot.lane.b32.xlu1 %v2509_v58, %s2144_s15 }
0x1456   :  { %v1422_v38 = vpop.permute.xlu1 %1421 }
0x1457   :  { %v1424_v39 = vmul.f32 %v1422_v38, %v1405_v24 }
0x1459   :  { %1426 = vrot.lane.b32.xlu0 %v1424_v39, %s2144_s15 }
0x145e   :  { %v742_v40 = vpop.permute.xlu1 %741 }
0x145f   :  { %745 = vst.msk [vmem:[#allocation3 + $0x4] sm:$0x3] %vm470_vm5, %v742_v40 }
0x1461   :  { %1444 = vrot.lane.b32.xlu0 %v1418_v33, %s2145_s10 }
0x1466   :  { %v1451_v41 = vld [vmem:[#allocation3 + $0x4] sm:$0x3]  ;;  %v1153_v42 = vpop.permute.xlu1 %1152 }
0x1467   :  { %1469 = vst [vmem:[#allocation1 + $0x2] ss:$4 sm:$0xff] %v1451_v41 }
0x1468   :  { %1156 = vst.msk [vmem:[#allocation3 + $0xa] sm:$0x3] %vm470_vm5, %v1153_v42 }
0x146e   :  { %v1433_v50 = vpop.permute.xlu1 %1432  ;;  %v1480_v51 = vld.sshfl [vmem:[#allocation1] sm:$0xff pattern:$0x73625140] }
0x146f   :  { %v1454_v43 = vld [vmem:[#allocation3 + $0xa] sm:$0x3]  ;;  %1435 = vst.msk [vmem:[#allocation20] sm:$0x3] %vm470_vm5, %v1433_v50 }
0x1470   :  { %1475 = vst [vmem:[#allocation1 + $0x21] ss:$4 sm:$0xff] %v1454_v43 }
0x14cb   :  { %v1427_v45 = vpop.permute.xlu0 %1426 }
0x14cc   :  { %1430 = vst.msk [vmem:[#allocation3 + $0xe] sm:$0x3] %vm470_vm5, %v1427_v45 }
0x14cd   :  { %1442 = vst.msk [vmem:[#allocation20 + $0x2] sm:$0x3] %vm470_vm5, %v1427_v45 }
0x14ce   :  { %1549 = dma.vmem_to_hbm [thread:$0]  %s1542_s1, 64, %s1544_s22, [#allocation21], %s2144_s15, %s2144_s15, %s2147_s23  }
0x14d3   :  { %v1456_v47 = vld [vmem:[#allocation3 + $0xe] sm:$0x3]  ;;  %v1445_v48 = vpop.permute.xlu0 %1444 }
0x14d4   :  { %1479 = vst [vmem:[#allocation1 + $0x23] ss:$4 sm:$0xff] %v1456_v47 }
0x14d5   :  { %1448 = vst.msk [vmem:[#allocation22 + $0x2] sm:$0x3] %vm470_vm5, %v1445_v48 }
0x14d6   :  { %1562 = dma.vmem_to_hbm [thread:$0]  %s1555_s26, 64, %s1557_s2, [#allocation21], %s2144_s15, %s2144_s15, %s2147_s23  }
0x14db   :  { %v1481_v59 = vld.sshfl [vmem:[#allocation1 + $0x20] sm:$0xff pattern:$0x73625140] }
0x14dc   :  { %v1484_v62 = vpack.c.bf16 %v1481_v59, %v1480_v51 }
0x14de   :  { %1665 = vmatmul.msk.bf16.vlgmr.msra.gmra.mxu1 %vm230_vm0, %v1484_v62 }
0x155b   :  { %v1517_v6 = vpop.f32.mrf.mxu1 }
0x155c   :  { %v1518_v7 = vadd.f32 %v1699_v56, %v1517_v6 }
0x155e   :  { %1522 = vst [vmem:[#allocation19] sm:$0xff] %v1518_v7 }
0x1563   :  { %v1519_v60 = vpop.f32.mrf.mxu1 }
0x1564   :  { %v1520_v63 = vadd.f32 %v1699_v56, %v1519_v60 }
0x1566   :  { %1523 = vst [vmem:[#allocation19 + $0x8] sm:$0xff] %v1520_v63 }
0x1567   :  { %1536 = dma.vmem_to_hbm [thread:$0]  %s1529_s27, 256, %s1531_s29, [#allocation6], %s2150_s13, %s2150_s13, %s2151_s5  }
0x1568   :  { %2127 = dma.done.wait [#allocation6], 256  }
0x1569   :  { %2128 = vsyncadd [#allocation6], 4294967040 }
0x156a   :  { %2129 = dma.done.wait [#allocation21], 128  }
0x156b   :  { %2130 = vsyncadd [#allocation21], 4294967168 }
0x156c   :  { %1575 = vsyncpa [#allocation5], 1 }
0x156d   :  { %1576 = vsyncpa [#allocation8], 1 }
0x156e   :  { %1577 = vsyncpa [#allocation11], 1 }
0x156f   :  { %1578 = vsyncpa [#allocation14], 1 }
0x1570   :  { %1579 = vsyncpa [#allocation17], 1 }
0x1571   :  { %1580 = vsyncpa [#allocation6], 1 }
0x1572   :  { %1581 = vsyncpa [#allocation21], 1 }

</bundles_post_ra>
